<compile_context>
chip_gen: v7x
topology: tpu7x:2x2x1
jax: 0.10.0
libtpu: 0.0.40
codegen_flags: <defaults>
</compile_context>

<pallas_src>
import functools

import numpy as np
import jax
import jax.numpy as jnp
from jax.experimental import pallas as pl
from jax.experimental.pallas import tpu as pltpu


def _round_up(x, m):
    return (x + m - 1) // m * m


# ---------------------------------------------------------------------------
# Fused kernel: conv1 + pool1 + conv2 + pool2 + fc1 + fc2 + fc3 per batch block
# ---------------------------------------------------------------------------
def _lenet_fused_kernel(xp0_ref, xp1_ref, xp2_ref, xp3_ref,
                        w1_ref, b1_ref, w2_ref, b2_ref,
                        wf1_ref, bf1_ref, wf2_ref, bf2_ref, wf3_ref, bf3_ref,
                        o_ref, *, block_b):
    b1 = b1_ref[...]            # (1, 128) f32
    b2 = b2_ref[...]            # (1, 128) f32
    bf1 = bf1_ref[...]          # (1, 256) f32
    bf2 = bf2_ref[...]          # (1, 128) f32
    bf3 = bf3_ref[...]          # (1, 128) f32

    def pool_relu(top, bot, brow):
        # 2x2 max-pool: `top`/`bot` hold the two conv rows of each pool window;
        # the two conv columns live in lane blocks [0:128] (even ow) and
        # [128:256] (odd ow).  bias + ReLU go AFTER the max (bias is
        # per-channel-constant and ReLU is monotone, so they commute with max).
        m = jnp.maximum(jnp.maximum(top[:, :128], top[:, 128:256]),
                        jnp.maximum(bot[:, :128], bot[:, 128:256]))
        return jnp.maximum(m + brow, 0.0).astype(jnp.bfloat16)

    for b in range(block_b):
        # 4 row-phases of one image: phase r holds input rows r, r+4, ..., r+28.
        xph = (xp0_ref[b], xp1_ref[b], xp2_ref[b], xp3_ref[b])   # 4 x (8, 96) bf16

        # ---- conv1 (5x5, 3->6) as 5 accumulated row-Toeplitz GEMMs -----------
        # Conv output row (4q + j), q = 0..6, is row q of acc_j; input row
        # 4q + j + kh lives in phase (j+kh) % 4 at phase-row q + (j+kh)//4.
        def conv1_rows(j):
            acc = None
            for kh in range(5):
                r = j + kh
                lhs = xph[r % 4][(r // 4):(r // 4) + 7, :]              # (7, 96)
                t = jnp.dot(lhs, w1_ref[kh],
                            preferred_element_type=jnp.float32)        # (7, 256)
                acc = t if acc is None else acc + t
            return acc

        a0, a1, a2, a3 = conv1_rows(0), conv1_rows(1), conv1_rows(2), conv1_rows(3)
        # pooled row p = max(conv rows 2p, 2p+1); even p from (a0, a1), odd from (a2, a3)
        h1e = pool_relu(a0, a1, b1)   # (7,128) bf16: pooled rows 0,2,..,12 ; lane = wp*6+c (<84)
        h1o = pool_relu(a2, a3, b1)   # (7,128) bf16: pooled rows 1,3,..,13

        # ---- conv2 (5x5, 6->16), same trick on the pooled 14x14x6 map --------
        def conv2_rows(order):
            acc = None
            for kh, (src, off) in enumerate(order):
                t = jnp.dot(src[off:off + 5, :], w2_ref[kh],
                            preferred_element_type=jnp.float32)        # (5, 256)
                acc = t if acc is None else acc + t
            return acc

        # conv2 row 2p2   uses pooled rows 2p2+kh   -> e[p2], o[p2], e[p2+1], o[p2+1], e[p2+2]
        # conv2 row 2p2+1 uses pooled rows 2p2+1+kh -> o[p2], e[p2+1], o[p2+1], e[p2+2], o[p2+2]
        c_top = conv2_rows(((h1e, 0), (h1o, 0), (h1e, 1), (h1o, 1), (h1e, 2)))
        c_bot = conv2_rows(((h1o, 0), (h1e, 1), (h1o, 1), (h1e, 2), (h1o, 2)))
        h2 = pool_relu(c_top, c_bot, b2)   # (5,128) bf16: rows = pooled h, lane = wq*16+c2 (<80)

        # ---- fc1 (400 -> 256), decomposed over the 5 pooled rows --------------
        acc = None
        for h in range(5):
            t = jnp.dot(h2[h:h + 1, :], wf1_ref[h],
                        preferred_element_type=jnp.float32)             # (1, 256)
            acc = t if acc is None else acc + t
        z1 = jnp.maximum(acc + bf1, 0.0).astype(jnp.bfloat16)           # (1, 256)

        # ---- fc2 (256 -> 128) + fc3 (128 -> num_classes, padded to 128) -------
        z2 = jnp.maximum(
            jnp.dot(z1, wf2_ref[...], preferred_element_type=jnp.float32) + bf2,
            0.0).astype(jnp.bfloat16)                                    # (1, 128)
        z3 = jnp.dot(z2, wf3_ref[...], preferred_element_type=jnp.float32) + bf3
        o_ref[b] = z3                                                    # (1, 128) f32


# ---------------------------------------------------------------------------
# Wrapper around pallas_call
# ---------------------------------------------------------------------------
def lenet_pallas_logits(prepped, x, *, block_b=1):
    """x: (B, 3, 32, 32) f32 NCHW -> padded logits (B, 128) f32."""
    B = x.shape[0]
    assert x.shape[1:] == (3, 32, 32), x.shape
    # NCHW -> NHWC, cast to bf16 BEFORE any expansion, flatten (W, C) onto lanes.
    xl = jnp.transpose(x, (0, 2, 3, 1)).astype(jnp.bfloat16).reshape(B, 32, 96)
    # Split rows into the 4 residues mod 4 so every in-kernel row window
    # (conv taps and 2x2 row pooling) is a contiguous static slice.
    phases = [xl[:, r::4, :] for r in range(4)]              # 4 x (B, 8, 96) bf16

    Bp = _round_up(B, block_b)
    if Bp != B:
        phases = [jnp.pad(p, ((0, Bp - B), (0, 0), (0, 0))) for p in phases]

    (w1, b1, w2, b2, wf1, bf1, wf2, bf2, wf3, bf3) = prepped

    def full_spec(a):
        return pl.BlockSpec(a.shape, lambda i: (0,) * a.ndim)

    out = pl.pallas_call(
        functools.partial(_lenet_fused_kernel, block_b=block_b),
        out_shape=jax.ShapeDtypeStruct((Bp, 1, 128), jnp.float32),
        grid=(Bp // block_b,),
        in_specs=(
            [pl.BlockSpec((block_b, 8, 96), lambda i: (i, 0, 0))] * 4
            + [full_spec(a) for a in (w1, b1, w2, b2, wf1, bf1, wf2, bf2, wf3, bf3)]
        ),
        out_specs=pl.BlockSpec((block_b, 1, 128), lambda i: (i, 0, 0)),
        compiler_params=pltpu.CompilerParams(dimension_semantics=("parallel",)),
    )(*phases, w1, b1, w2, b2, wf1, bf1, wf2, bf2, wf3, bf3)
    return out[:B, 0, :]


@functools.partial(jax.jit, static_argnames=("block_b",))
def lenet_apply(prepped, x, block_b=1):
    return lenet_pallas_logits(prepped, x, block_b=block_b)


# ---------------------------------------------------------------------------
# Parameters (PyTorch layout) and one-time kernel-layout preparation
# ---------------------------------------------------------------------------
def init_lenet_params(key, num_classes=100):
    ks = jax.random.split(key, 10)
    s = 0.05
    return {
        "conv1_w": s * jax.random.normal(ks[0], (6, 3, 5, 5), jnp.float32),
        "conv1_b": s * jax.random.normal(ks[1], (6,), jnp.float32),
        "conv2_w": s * jax.random.normal(ks[2], (16, 6, 5, 5), jnp.float32),
        "conv2_b": s * jax.random.normal(ks[3], (16,), jnp.float32),
        "fc1_w": s * jax.random.normal(ks[4], (256, 16 * 5 * 5), jnp.float32),
        "fc1_b": s * jax.random.normal(ks[5], (256,), jnp.float32),
        "fc2_w": s * jax.random.normal(ks[6], (128, 256), jnp.float32),
        "fc2_b": s * jax.random.normal(ks[7], (128,), jnp.float32),
        "fc3_w": s * jax.random.normal(ks[8], (num_classes, 128), jnp.float32),
        "fc3_b": s * jax.random.normal(ks[9], (num_classes,), jnp.float32),
    }


def _conv_toeplitz_cat(w, b, wp_out, k_lanes, n_half):
    """Per-kh Toeplitz GEMM weights for a stride-1 valid conv, with output
    columns split into an even-ow block ([0:n_half]) and odd-ow block
    ([n_half:2*n_half]) so the width max-pool is an element-wise lane-block max.

    T[kh, wi*C + c, parity*n_half + wp*OC + oc] = w[oc, c, kh, wi - (2*wp + parity)]
    """
    oc, ci, khs, kws = w.shape
    t = np.zeros((khs, k_lanes, 2 * n_half), np.float32)
    for parity in range(2):
        for kh in range(khs):
            for wp in range(wp_out):
                for kw in range(kws):
                    wi = 2 * wp + parity + kw                 # input column index
                    t[kh, wi * ci:(wi + 1) * ci,
                      parity * n_half + wp * oc: parity * n_half + (wp + 1) * oc] = \
                        w[:, :, kh, kw].T
    brow = np.zeros((1, n_half), np.float32)
    for wp in range(wp_out):
        brow[0, wp * oc:(wp + 1) * oc] = b
    return t, brow


def prepare_lenet_params(p, num_classes=100):
    assert num_classes <= 128
    cw1 = np.asarray(p["conv1_w"], np.float32); cb1 = np.asarray(p["conv1_b"], np.float32)
    cw2 = np.asarray(p["conv2_w"], np.float32); cb2 = np.asarray(p["conv2_b"], np.float32)
    f1w = np.asarray(p["fc1_w"], np.float32);  f1b = np.asarray(p["fc1_b"], np.float32)
    f2w = np.asarray(p["fc2_w"], np.float32);  f2b = np.asarray(p["fc2_b"], np.float32)
    f3w = np.asarray(p["fc3_w"], np.float32);  f3b = np.asarray(p["fc3_b"], np.float32)

    # conv1: input lanes = 32*3 = 96, 14 pooled output columns, 6 out channels.
    w1, b1row = _conv_toeplitz_cat(cw1, cb1, wp_out=14, k_lanes=96, n_half=128)
    # conv2: input lanes = 14*6 = 84 (padded to 128), 5 pooled columns, 16 out ch.
    w2, b2row = _conv_toeplitz_cat(cw2, cb2, wp_out=5, k_lanes=128, n_half=128)

    # fc1, decomposed over the 5 pooled rows; PyTorch flatten order is (c, h, w),
    # our lane order within a row is (w, c) -> permute columns once here.
    wf1 = np.zeros((5, 128, 256), np.float32)
    for h in range(5):
        for wq in range(5):
            for c in range(16):
                wf1[h, wq * 16 + c, :] = f1w[:, c * 25 + h * 5 + wq]
    bf1 = f1b.reshape(1, 256)

    wf2 = f2w.T                                               # (256, 128)
    bf2 = f2b.reshape(1, 128)

    wf3 = np.zeros((128, 128), np.float32)                    # pad N to 128 lanes
    wf3[:, :num_classes] = f3w.T
    bf3 = np.zeros((1, 128), np.float32)
    bf3[0, :num_classes] = f3b

    bf16 = lambda a: jnp.asarray(a, jnp.bfloat16)
    f32 = lambda a: jnp.asarray(a, jnp.float32)
    return (bf16(w1), f32(b1row), bf16(w2), f32(b2row),
            bf16(wf1), f32(bf1), bf16(wf2), f32(bf2), bf16(wf3), f32(bf3))


# ---------------------------------------------------------------------------
# Forward pass (matches torch LeNet.forward: returns (logits, shape_dict))
# ---------------------------------------------------------------------------
def lenet_forward(prepped, x, num_classes=100, block_b=1):
    logits = lenet_apply(prepped, x, block_b=block_b)[:, :num_classes]
    B, _, H, W = x.shape
    h1, w1 = (H - 4) // 2, (W - 4) // 2
    h2, w2 = (h1 - 4) // 2, (w1 - 4) // 2
    shape_dict = {
        1: [B, 6, h1, w1],
        2: [B, 16, h2, w2],
        3: [B, 16 * h2 * w2],
        4: [B, 256],
        5: [B, 128],
        6: [B, num_classes],
    }
    return logits, shape_dict


# ---------------------------------------------------------------------------
# Pure-JAX reference (f32) for a tolerance-based correctness check
# ---------------------------------------------------------------------------
def lenet_reference(p, x):
    def conv(a, w, b):
        y = jax.lax.conv_general_dilated(a, w, (1, 1), "VALID",
                                         dimension_numbers=("NCHW", "OIHW", "NCHW"))
        return y + b[None, :, None, None]

    def pool(a):
        return jax.lax.reduce_window(a, -jnp.inf, jax.lax.max,
                                     (1, 1, 2, 2), (1, 1, 2, 2), "VALID")

    a = pool(jax.nn.relu(conv(x, p["conv1_w"], p["conv1_b"])))
    a = pool(jax.nn.relu(conv(a, p["conv2_w"], p["conv2_b"])))
    a = a.reshape(a.shape[0], -1)
    a = jax.nn.relu(a @ p["fc1_w"].T + p["fc1_b"])
    a = jax.nn.relu(a @ p["fc2_w"].T + p["fc2_b"])
    return a @ p["fc3_w"].T + p["fc3_b"]


if __name__ == "__main__":
    key = jax.random.PRNGKey(0)
    k_param, k_x = jax.random.split(key)
    num_classes = 100
    params = init_lenet_params(k_param, num_classes=num_classes)
    prepped = prepare_lenet_params(params, num_classes=num_classes)
    # LeNet's fc_1 (16*5*5 inputs) requires 32x32 spatial input; batch = 2
    # (grid of 2 "parallel" steps -> both v7x TensorCores get work).
    x = jax.random.normal(k_x, (2, 3, 32, 32), jnp.float32)

    logits, shape_dict = lenet_forward(prepped, x, num_classes=num_classes)
    logits = jax.block_until_ready(logits)

    assert logits.shape == (2, num_classes), logits.shape
    assert bool(jnp.all(jnp.isfinite(logits)))
    assert shape_dict[1] == [2, 6, 14, 14]
    assert shape_dict[2] == [2, 16, 5, 5]
    assert shape_dict[3] == [2, 400]
    assert shape_dict[4] == [2, 256]
    assert shape_dict[5] == [2, 128]
    assert shape_dict[6] == [2, num_classes]

    # Tolerance-based check vs. an f32 pure-JAX reference (kernel uses bf16
    # inputs/weights/activations with f32 accumulation).
    ref = lenet_reference(params, x)
    err = float(jnp.max(jnp.abs(logits - ref)))
    tol = 3e-2 + 5e-2 * float(jnp.max(jnp.abs(ref)))
    assert err <= tol, (err, tol)

    print("KERNEL_OK")
</pallas_src>

<mosaic_0001>
module attributes {stable_mosaic.version = 11 : i64} {
  func.func @_lenet_fused_kernel(%arg0: i32, %arg1: memref<1x8x96xbf16, #tpu.memory_space<vmem>>, %arg2: memref<1x8x96xbf16, #tpu.memory_space<vmem>>, %arg3: memref<1x8x96xbf16, #tpu.memory_space<vmem>>, %arg4: memref<1x8x96xbf16, #tpu.memory_space<vmem>>, %arg5: memref<5x96x256xbf16, #tpu.memory_space<vmem>>, %arg6: memref<1x128xf32, #tpu.memory_space<vmem>>, %arg7: memref<5x128x256xbf16, #tpu.memory_space<vmem>>, %arg8: memref<1x128xf32, #tpu.memory_space<vmem>>, %arg9: memref<5x128x256xbf16, #tpu.memory_space<vmem>>, %arg10: memref<1x256xf32, #tpu.memory_space<vmem>>, %arg11: memref<256x128xbf16, #tpu.memory_space<vmem>>, %arg12: memref<1x128xf32, #tpu.memory_space<vmem>>, %arg13: memref<128x128xbf16, #tpu.memory_space<vmem>>, %arg14: memref<1x128xf32, #tpu.memory_space<vmem>>, %arg15: memref<1x1x128xf32, #tpu.memory_space<vmem>>) attributes {dimension_semantics = [#tpu.dimension_semantics<parallel>], iteration_bounds = array<i64: 2>, scalar_prefetch = 0 : i64, scratch_operands = 0 : i64, tpu.core_type = #tpu.core_type<tc>, window_params = [{transform_indices = @transform_0, window_bounds = array<i64: 1, 8, 96>}, {transform_indices = @transform_1, window_bounds = array<i64: 1, 8, 96>}, {transform_indices = @transform_2, window_bounds = array<i64: 1, 8, 96>}, {transform_indices = @transform_3, window_bounds = array<i64: 1, 8, 96>}, {pipeline_mode = #tpu.pipeline_mode<synchronous>, transform_indices = @transform_4, window_bounds = array<i64: 5, 96, 256>}, {pipeline_mode = #tpu.pipeline_mode<synchronous>, transform_indices = @transform_5, window_bounds = array<i64: 1, 128>}, {pipeline_mode = #tpu.pipeline_mode<synchronous>, transform_indices = @transform_6, window_bounds = array<i64: 5, 128, 256>}, {pipeline_mode = #tpu.pipeline_mode<synchronous>, transform_indices = @transform_7, window_bounds = array<i64: 1, 128>}, {pipeline_mode = #tpu.pipeline_mode<synchronous>, transform_indices = @transform_8, window_bounds = array<i64: 5, 128, 256>}, {pipeline_mode = #tpu.pipeline_mode<synchronous>, transform_indices = @transform_9, window_bounds = array<i64: 1, 256>}, {pipeline_mode = #tpu.pipeline_mode<synchronous>, transform_indices = @transform_10, window_bounds = array<i64: 256, 128>}, {pipeline_mode = #tpu.pipeline_mode<synchronous>, transform_indices = @transform_11, window_bounds = array<i64: 1, 128>}, {pipeline_mode = #tpu.pipeline_mode<synchronous>, transform_indices = @transform_12, window_bounds = array<i64: 128, 128>}, {pipeline_mode = #tpu.pipeline_mode<synchronous>, transform_indices = @transform_13, window_bounds = array<i64: 1, 128>}, {transform_indices = @transform_14, window_bounds = array<i64: 1, 1, 128>}]} {
    %c0 = arith.constant 0 : index
    %c0_0 = arith.constant 0 : index
    %0 = vector.load %arg6[%c0, %c0_0] : memref<1x128xf32, #tpu.memory_space<vmem>>, vector<1x128xf32>
    %c0_1 = arith.constant 0 : index
    %c0_2 = arith.constant 0 : index
    %1 = vector.load %arg8[%c0_1, %c0_2] : memref<1x128xf32, #tpu.memory_space<vmem>>, vector<1x128xf32>
    %c0_3 = arith.constant 0 : index
    %c0_4 = arith.constant 0 : index
    %2 = vector.load %arg10[%c0_3, %c0_4] : memref<1x256xf32, #tpu.memory_space<vmem>>, vector<1x256xf32>
    %c0_5 = arith.constant 0 : index
    %c0_6 = arith.constant 0 : index
    %3 = vector.load %arg12[%c0_5, %c0_6] : memref<1x128xf32, #tpu.memory_space<vmem>>, vector<1x128xf32>
    %c0_7 = arith.constant 0 : index
    %c0_8 = arith.constant 0 : index
    %4 = vector.load %arg14[%c0_7, %c0_8] : memref<1x128xf32, #tpu.memory_space<vmem>>, vector<1x128xf32>
    %c0_9 = arith.constant 0 : index
    %c0_10 = arith.constant 0 : index
    %c0_11 = arith.constant 0 : index
    %5 = vector.load %arg1[%c0_9, %c0_10, %c0_11] : memref<1x8x96xbf16, #tpu.memory_space<vmem>>, vector<1x8x96xbf16>
    %6 = vector.shape_cast %5 : vector<1x8x96xbf16> to vector<8x96xbf16>
    %c0_12 = arith.constant 0 : index
    %c0_13 = arith.constant 0 : index
    %c0_14 = arith.constant 0 : index
    %7 = vector.load %arg2[%c0_12, %c0_13, %c0_14] : memref<1x8x96xbf16, #tpu.memory_space<vmem>>, vector<1x8x96xbf16>
    %8 = vector.shape_cast %7 : vector<1x8x96xbf16> to vector<8x96xbf16>
    %c0_15 = arith.constant 0 : index
    %c0_16 = arith.constant 0 : index
    %c0_17 = arith.constant 0 : index
    %9 = vector.load %arg3[%c0_15, %c0_16, %c0_17] : memref<1x8x96xbf16, #tpu.memory_space<vmem>>, vector<1x8x96xbf16>
    %10 = vector.shape_cast %9 : vector<1x8x96xbf16> to vector<8x96xbf16>
    %c0_18 = arith.constant 0 : index
    %c0_19 = arith.constant 0 : index
    %c0_20 = arith.constant 0 : index
    %11 = vector.load %arg4[%c0_18, %c0_19, %c0_20] : memref<1x8x96xbf16, #tpu.memory_space<vmem>>, vector<1x8x96xbf16>
    %12 = vector.shape_cast %11 : vector<1x8x96xbf16> to vector<8x96xbf16>
    %13 = vector.extract_strided_slice %6 {offsets = [0, 0], sizes = [7, 96], strides = [1, 1]} : vector<8x96xbf16> to vector<7x96xbf16>
    %c0_21 = arith.constant 0 : index
    %c0_22 = arith.constant 0 : index
    %c0_23 = arith.constant 0 : index
    %14 = vector.load %arg5[%c0_21, %c0_22, %c0_23] : memref<5x96x256xbf16, #tpu.memory_space<vmem>>, vector<1x96x256xbf16>
    %15 = vector.shape_cast %14 : vector<1x96x256xbf16> to vector<96x256xbf16>
    %cst = arith.constant dense<0.000000e+00> : vector<7x256xf32>
    %16 = tpu.matmul %13, %15, %cst {dimension_numbers = #tpu.dot_dimension_numbers<[1], [0], [0], [1], [0, 0, 1, 1], [], []>} : vector<7x96xbf16>, vector<96x256xbf16>, vector<7x256xf32> -> vector<7x256xf32>
    %17 = vector.extract_strided_slice %8 {offsets = [0, 0], sizes = [7, 96], strides = [1, 1]} : vector<8x96xbf16> to vector<7x96xbf16>
    %c1 = arith.constant 1 : index
    %c0_24 = arith.constant 0 : index
    %c0_25 = arith.constant 0 : index
    %18 = vector.load %arg5[%c1, %c0_24, %c0_25] : memref<5x96x256xbf16, #tpu.memory_space<vmem>>, vector<1x96x256xbf16>
    %19 = vector.shape_cast %18 : vector<1x96x256xbf16> to vector<96x256xbf16>
    %cst_26 = arith.constant dense<0.000000e+00> : vector<7x256xf32>
    %20 = tpu.matmul %17, %19, %cst_26 {dimension_numbers = #tpu.dot_dimension_numbers<[1], [0], [0], [1], [0, 0, 1, 1], [], []>} : vector<7x96xbf16>, vector<96x256xbf16>, vector<7x256xf32> -> vector<7x256xf32>
    %21 = arith.addf %16, %20 : vector<7x256xf32>
    %22 = vector.extract_strided_slice %10 {offsets = [0, 0], sizes = [7, 96], strides = [1, 1]} : vector<8x96xbf16> to vector<7x96xbf16>
    %c2 = arith.constant 2 : index
    %c0_27 = arith.constant 0 : index
    %c0_28 = arith.constant 0 : index
    %23 = vector.load %arg5[%c2, %c0_27, %c0_28] : memref<5x96x256xbf16, #tpu.memory_space<vmem>>, vector<1x96x256xbf16>
    %24 = vector.shape_cast %23 : vector<1x96x256xbf16> to vector<96x256xbf16>
    %cst_29 = arith.constant dense<0.000000e+00> : vector<7x256xf32>
    %25 = tpu.matmul %22, %24, %cst_29 {dimension_numbers = #tpu.dot_dimension_numbers<[1], [0], [0], [1], [0, 0, 1, 1], [], []>} : vector<7x96xbf16>, vector<96x256xbf16>, vector<7x256xf32> -> vector<7x256xf32>
    %26 = arith.addf %21, %25 : vector<7x256xf32>
    %27 = vector.extract_strided_slice %12 {offsets = [0, 0], sizes = [7, 96], strides = [1, 1]} : vector<8x96xbf16> to vector<7x96xbf16>
    %c3 = arith.constant 3 : index
    %c0_30 = arith.constant 0 : index
    %c0_31 = arith.constant 0 : index
    %28 = vector.load %arg5[%c3, %c0_30, %c0_31] : memref<5x96x256xbf16, #tpu.memory_space<vmem>>, vector<1x96x256xbf16>
    %29 = vector.shape_cast %28 : vector<1x96x256xbf16> to vector<96x256xbf16>
    %cst_32 = arith.constant dense<0.000000e+00> : vector<7x256xf32>
    %30 = tpu.matmul %27, %29, %cst_32 {dimension_numbers = #tpu.dot_dimension_numbers<[1], [0], [0], [1], [0, 0, 1, 1], [], []>} : vector<7x96xbf16>, vector<96x256xbf16>, vector<7x256xf32> -> vector<7x256xf32>
    %31 = arith.addf %26, %30 : vector<7x256xf32>
    %32 = vector.extract_strided_slice %6 {offsets = [1, 0], sizes = [7, 96], strides = [1, 1]} : vector<8x96xbf16> to vector<7x96xbf16>
    %c4 = arith.constant 4 : index
    %c0_33 = arith.constant 0 : index
    %c0_34 = arith.constant 0 : index
    %33 = vector.load %arg5[%c4, %c0_33, %c0_34] : memref<5x96x256xbf16, #tpu.memory_space<vmem>>, vector<1x96x256xbf16>
    %34 = vector.shape_cast %33 : vector<1x96x256xbf16> to vector<96x256xbf16>
    %cst_35 = arith.constant dense<0.000000e+00> : vector<7x256xf32>
    %35 = tpu.matmul %32, %34, %cst_35 {dimension_numbers = #tpu.dot_dimension_numbers<[1], [0], [0], [1], [0, 0, 1, 1], [], []>} : vector<7x96xbf16>, vector<96x256xbf16>, vector<7x256xf32> -> vector<7x256xf32>
    %36 = arith.addf %31, %35 : vector<7x256xf32>
    %37 = vector.extract_strided_slice %8 {offsets = [0, 0], sizes = [7, 96], strides = [1, 1]} : vector<8x96xbf16> to vector<7x96xbf16>
    %c0_36 = arith.constant 0 : index
    %c0_37 = arith.constant 0 : index
    %c0_38 = arith.constant 0 : index
    %38 = vector.load %arg5[%c0_36, %c0_37, %c0_38] : memref<5x96x256xbf16, #tpu.memory_space<vmem>>, vector<1x96x256xbf16>
    %39 = vector.shape_cast %38 : vector<1x96x256xbf16> to vector<96x256xbf16>
    %cst_39 = arith.constant dense<0.000000e+00> : vector<7x256xf32>
    %40 = tpu.matmul %37, %39, %cst_39 {dimension_numbers = #tpu.dot_dimension_numbers<[1], [0], [0], [1], [0, 0, 1, 1], [], []>} : vector<7x96xbf16>, vector<96x256xbf16>, vector<7x256xf32> -> vector<7x256xf32>
    %41 = vector.extract_strided_slice %10 {offsets = [0, 0], sizes = [7, 96], strides = [1, 1]} : vector<8x96xbf16> to vector<7x96xbf16>
    %c1_40 = arith.constant 1 : index
    %c0_41 = arith.constant 0 : index
    %c0_42 = arith.constant 0 : index
    %42 = vector.load %arg5[%c1_40, %c0_41, %c0_42] : memref<5x96x256xbf16, #tpu.memory_space<vmem>>, vector<1x96x256xbf16>
    %43 = vector.shape_cast %42 : vector<1x96x256xbf16> to vector<96x256xbf16>
    %cst_43 = arith.constant dense<0.000000e+00> : vector<7x256xf32>
    %44 = tpu.matmul %41, %43, %cst_43 {dimension_numbers = #tpu.dot_dimension_numbers<[1], [0], [0], [1], [0, 0, 1, 1], [], []>} : vector<7x96xbf16>, vector<96x256xbf16>, vector<7x256xf32> -> vector<7x256xf32>
    %45 = arith.addf %40, %44 : vector<7x256xf32>
    %46 = vector.extract_strided_slice %12 {offsets = [0, 0], sizes = [7, 96], strides = [1, 1]} : vector<8x96xbf16> to vector<7x96xbf16>
    %c2_44 = arith.constant 2 : index
    %c0_45 = arith.constant 0 : index
    %c0_46 = arith.constant 0 : index
    %47 = vector.load %arg5[%c2_44, %c0_45, %c0_46] : memref<5x96x256xbf16, #tpu.memory_space<vmem>>, vector<1x96x256xbf16>
    %48 = vector.shape_cast %47 : vector<1x96x256xbf16> to vector<96x256xbf16>
    %cst_47 = arith.constant dense<0.000000e+00> : vector<7x256xf32>
    %49 = tpu.matmul %46, %48, %cst_47 {dimension_numbers = #tpu.dot_dimension_numbers<[1], [0], [0], [1], [0, 0, 1, 1], [], []>} : vector<7x96xbf16>, vector<96x256xbf16>, vector<7x256xf32> -> vector<7x256xf32>
    %50 = arith.addf %45, %49 : vector<7x256xf32>
    %51 = vector.extract_strided_slice %6 {offsets = [1, 0], sizes = [7, 96], strides = [1, 1]} : vector<8x96xbf16> to vector<7x96xbf16>
    %c3_48 = arith.constant 3 : index
    %c0_49 = arith.constant 0 : index
    %c0_50 = arith.constant 0 : index
    %52 = vector.load %arg5[%c3_48, %c0_49, %c0_50] : memref<5x96x256xbf16, #tpu.memory_space<vmem>>, vector<1x96x256xbf16>
    %53 = vector.shape_cast %52 : vector<1x96x256xbf16> to vector<96x256xbf16>
    %cst_51 = arith.constant dense<0.000000e+00> : vector<7x256xf32>
    %54 = tpu.matmul %51, %53, %cst_51 {dimension_numbers = #tpu.dot_dimension_numbers<[1], [0], [0], [1], [0, 0, 1, 1], [], []>} : vector<7x96xbf16>, vector<96x256xbf16>, vector<7x256xf32> -> vector<7x256xf32>
    %55 = arith.addf %50, %54 : vector<7x256xf32>
    %56 = vector.extract_strided_slice %8 {offsets = [1, 0], sizes = [7, 96], strides = [1, 1]} : vector<8x96xbf16> to vector<7x96xbf16>
    %c4_52 = arith.constant 4 : index
    %c0_53 = arith.constant 0 : index
    %c0_54 = arith.constant 0 : index
    %57 = vector.load %arg5[%c4_52, %c0_53, %c0_54] : memref<5x96x256xbf16, #tpu.memory_space<vmem>>, vector<1x96x256xbf16>
    %58 = vector.shape_cast %57 : vector<1x96x256xbf16> to vector<96x256xbf16>
    %cst_55 = arith.constant dense<0.000000e+00> : vector<7x256xf32>
    %59 = tpu.matmul %56, %58, %cst_55 {dimension_numbers = #tpu.dot_dimension_numbers<[1], [0], [0], [1], [0, 0, 1, 1], [], []>} : vector<7x96xbf16>, vector<96x256xbf16>, vector<7x256xf32> -> vector<7x256xf32>
    %60 = arith.addf %55, %59 : vector<7x256xf32>
    %61 = vector.extract_strided_slice %10 {offsets = [0, 0], sizes = [7, 96], strides = [1, 1]} : vector<8x96xbf16> to vector<7x96xbf16>
    %c0_56 = arith.constant 0 : index
    %c0_57 = arith.constant 0 : index
    %c0_58 = arith.constant 0 : index
    %62 = vector.load %arg5[%c0_56, %c0_57, %c0_58] : memref<5x96x256xbf16, #tpu.memory_space<vmem>>, vector<1x96x256xbf16>
    %63 = vector.shape_cast %62 : vector<1x96x256xbf16> to vector<96x256xbf16>
    %cst_59 = arith.constant dense<0.000000e+00> : vector<7x256xf32>
    %64 = tpu.matmul %61, %63, %cst_59 {dimension_numbers = #tpu.dot_dimension_numbers<[1], [0], [0], [1], [0, 0, 1, 1], [], []>} : vector<7x96xbf16>, vector<96x256xbf16>, vector<7x256xf32> -> vector<7x256xf32>
    %65 = vector.extract_strided_slice %12 {offsets = [0, 0], sizes = [7, 96], strides = [1, 1]} : vector<8x96xbf16> to vector<7x96xbf16>
    %c1_60 = arith.constant 1 : index
    %c0_61 = arith.constant 0 : index
    %c0_62 = arith.constant 0 : index
    %66 = vector.load %arg5[%c1_60, %c0_61, %c0_62] : memref<5x96x256xbf16, #tpu.memory_space<vmem>>, vector<1x96x256xbf16>
    %67 = vector.shape_cast %66 : vector<1x96x256xbf16> to vector<96x256xbf16>
    %cst_63 = arith.constant dense<0.000000e+00> : vector<7x256xf32>
    %68 = tpu.matmul %65, %67, %cst_63 {dimension_numbers = #tpu.dot_dimension_numbers<[1], [0], [0], [1], [0, 0, 1, 1], [], []>} : vector<7x96xbf16>, vector<96x256xbf16>, vector<7x256xf32> -> vector<7x256xf32>
    %69 = arith.addf %64, %68 : vector<7x256xf32>
    %70 = vector.extract_strided_slice %6 {offsets = [1, 0], sizes = [7, 96], strides = [1, 1]} : vector<8x96xbf16> to vector<7x96xbf16>
    %c2_64 = arith.constant 2 : index
    %c0_65 = arith.constant 0 : index
    %c0_66 = arith.constant 0 : index
    %71 = vector.load %arg5[%c2_64, %c0_65, %c0_66] : memref<5x96x256xbf16, #tpu.memory_space<vmem>>, vector<1x96x256xbf16>
    %72 = vector.shape_cast %71 : vector<1x96x256xbf16> to vector<96x256xbf16>
    %cst_67 = arith.constant dense<0.000000e+00> : vector<7x256xf32>
    %73 = tpu.matmul %70, %72, %cst_67 {dimension_numbers = #tpu.dot_dimension_numbers<[1], [0], [0], [1], [0, 0, 1, 1], [], []>} : vector<7x96xbf16>, vector<96x256xbf16>, vector<7x256xf32> -> vector<7x256xf32>
    %74 = arith.addf %69, %73 : vector<7x256xf32>
    %75 = vector.extract_strided_slice %8 {offsets = [1, 0], sizes = [7, 96], strides = [1, 1]} : vector<8x96xbf16> to vector<7x96xbf16>
    %c3_68 = arith.constant 3 : index
    %c0_69 = arith.constant 0 : index
    %c0_70 = arith.constant 0 : index
    %76 = vector.load %arg5[%c3_68, %c0_69, %c0_70] : memref<5x96x256xbf16, #tpu.memory_space<vmem>>, vector<1x96x256xbf16>
    %77 = vector.shape_cast %76 : vector<1x96x256xbf16> to vector<96x256xbf16>
    %cst_71 = arith.constant dense<0.000000e+00> : vector<7x256xf32>
    %78 = tpu.matmul %75, %77, %cst_71 {dimension_numbers = #tpu.dot_dimension_numbers<[1], [0], [0], [1], [0, 0, 1, 1], [], []>} : vector<7x96xbf16>, vector<96x256xbf16>, vector<7x256xf32> -> vector<7x256xf32>
    %79 = arith.addf %74, %78 : vector<7x256xf32>
    %80 = vector.extract_strided_slice %10 {offsets = [1, 0], sizes = [7, 96], strides = [1, 1]} : vector<8x96xbf16> to vector<7x96xbf16>
    %c4_72 = arith.constant 4 : index
    %c0_73 = arith.constant 0 : index
    %c0_74 = arith.constant 0 : index
    %81 = vector.load %arg5[%c4_72, %c0_73, %c0_74] : memref<5x96x256xbf16, #tpu.memory_space<vmem>>, vector<1x96x256xbf16>
    %82 = vector.shape_cast %81 : vector<1x96x256xbf16> to vector<96x256xbf16>
    %cst_75 = arith.constant dense<0.000000e+00> : vector<7x256xf32>
    %83 = tpu.matmul %80, %82, %cst_75 {dimension_numbers = #tpu.dot_dimension_numbers<[1], [0], [0], [1], [0, 0, 1, 1], [], []>} : vector<7x96xbf16>, vector<96x256xbf16>, vector<7x256xf32> -> vector<7x256xf32>
    %84 = arith.addf %79, %83 : vector<7x256xf32>
    %85 = vector.extract_strided_slice %12 {offsets = [0, 0], sizes = [7, 96], strides = [1, 1]} : vector<8x96xbf16> to vector<7x96xbf16>
    %c0_76 = arith.constant 0 : index
    %c0_77 = arith.constant 0 : index
    %c0_78 = arith.constant 0 : index
    %86 = vector.load %arg5[%c0_76, %c0_77, %c0_78] : memref<5x96x256xbf16, #tpu.memory_space<vmem>>, vector<1x96x256xbf16>
    %87 = vector.shape_cast %86 : vector<1x96x256xbf16> to vector<96x256xbf16>
    %cst_79 = arith.constant dense<0.000000e+00> : vector<7x256xf32>
    %88 = tpu.matmul %85, %87, %cst_79 {dimension_numbers = #tpu.dot_dimension_numbers<[1], [0], [0], [1], [0, 0, 1, 1], [], []>} : vector<7x96xbf16>, vector<96x256xbf16>, vector<7x256xf32> -> vector<7x256xf32>
    %89 = vector.extract_strided_slice %6 {offsets = [1, 0], sizes = [7, 96], strides = [1, 1]} : vector<8x96xbf16> to vector<7x96xbf16>
    %c1_80 = arith.constant 1 : index
    %c0_81 = arith.constant 0 : index
    %c0_82 = arith.constant 0 : index
    %90 = vector.load %arg5[%c1_80, %c0_81, %c0_82] : memref<5x96x256xbf16, #tpu.memory_space<vmem>>, vector<1x96x256xbf16>
    %91 = vector.shape_cast %90 : vector<1x96x256xbf16> to vector<96x256xbf16>
    %cst_83 = arith.constant dense<0.000000e+00> : vector<7x256xf32>
    %92 = tpu.matmul %89, %91, %cst_83 {dimension_numbers = #tpu.dot_dimension_numbers<[1], [0], [0], [1], [0, 0, 1, 1], [], []>} : vector<7x96xbf16>, vector<96x256xbf16>, vector<7x256xf32> -> vector<7x256xf32>
    %93 = arith.addf %88, %92 : vector<7x256xf32>
    %94 = vector.extract_strided_slice %8 {offsets = [1, 0], sizes = [7, 96], strides = [1, 1]} : vector<8x96xbf16> to vector<7x96xbf16>
    %c2_84 = arith.constant 2 : index
    %c0_85 = arith.constant 0 : index
    %c0_86 = arith.constant 0 : index
    %95 = vector.load %arg5[%c2_84, %c0_85, %c0_86] : memref<5x96x256xbf16, #tpu.memory_space<vmem>>, vector<1x96x256xbf16>
    %96 = vector.shape_cast %95 : vector<1x96x256xbf16> to vector<96x256xbf16>
    %cst_87 = arith.constant dense<0.000000e+00> : vector<7x256xf32>
    %97 = tpu.matmul %94, %96, %cst_87 {dimension_numbers = #tpu.dot_dimension_numbers<[1], [0], [0], [1], [0, 0, 1, 1], [], []>} : vector<7x96xbf16>, vector<96x256xbf16>, vector<7x256xf32> -> vector<7x256xf32>
    %98 = arith.addf %93, %97 : vector<7x256xf32>
    %99 = vector.extract_strided_slice %10 {offsets = [1, 0], sizes = [7, 96], strides = [1, 1]} : vector<8x96xbf16> to vector<7x96xbf16>
    %c3_88 = arith.constant 3 : index
    %c0_89 = arith.constant 0 : index
    %c0_90 = arith.constant 0 : index
    %100 = vector.load %arg5[%c3_88, %c0_89, %c0_90] : memref<5x96x256xbf16, #tpu.memory_space<vmem>>, vector<1x96x256xbf16>
    %101 = vector.shape_cast %100 : vector<1x96x256xbf16> to vector<96x256xbf16>
    %cst_91 = arith.constant dense<0.000000e+00> : vector<7x256xf32>
    %102 = tpu.matmul %99, %101, %cst_91 {dimension_numbers = #tpu.dot_dimension_numbers<[1], [0], [0], [1], [0, 0, 1, 1], [], []>} : vector<7x96xbf16>, vector<96x256xbf16>, vector<7x256xf32> -> vector<7x256xf32>
    %103 = arith.addf %98, %102 : vector<7x256xf32>
    %104 = vector.extract_strided_slice %12 {offsets = [1, 0], sizes = [7, 96], strides = [1, 1]} : vector<8x96xbf16> to vector<7x96xbf16>
    %c4_92 = arith.constant 4 : index
    %c0_93 = arith.constant 0 : index
    %c0_94 = arith.constant 0 : index
    %105 = vector.load %arg5[%c4_92, %c0_93, %c0_94] : memref<5x96x256xbf16, #tpu.memory_space<vmem>>, vector<1x96x256xbf16>
    %106 = vector.shape_cast %105 : vector<1x96x256xbf16> to vector<96x256xbf16>
    %cst_95 = arith.constant dense<0.000000e+00> : vector<7x256xf32>
    %107 = tpu.matmul %104, %106, %cst_95 {dimension_numbers = #tpu.dot_dimension_numbers<[1], [0], [0], [1], [0, 0, 1, 1], [], []>} : vector<7x96xbf16>, vector<96x256xbf16>, vector<7x256xf32> -> vector<7x256xf32>
    %108 = arith.addf %103, %107 : vector<7x256xf32>
    %109 = vector.extract_strided_slice %36 {offsets = [0, 0], sizes = [7, 128], strides = [1, 1]} : vector<7x256xf32> to vector<7x128xf32>
    %110 = vector.extract_strided_slice %36 {offsets = [0, 128], sizes = [7, 128], strides = [1, 1]} : vector<7x256xf32> to vector<7x128xf32>
    %111 = arith.maximumf %109, %110 : vector<7x128xf32>
    %112 = vector.extract_strided_slice %60 {offsets = [0, 0], sizes = [7, 128], strides = [1, 1]} : vector<7x256xf32> to vector<7x128xf32>
    %113 = vector.extract_strided_slice %60 {offsets = [0, 128], sizes = [7, 128], strides = [1, 1]} : vector<7x256xf32> to vector<7x128xf32>
    %114 = arith.maximumf %112, %113 : vector<7x128xf32>
    %115 = arith.maximumf %111, %114 : vector<7x128xf32>
    %116 = vector.broadcast %0 : vector<1x128xf32> to vector<7x128xf32>
    %117 = arith.addf %115, %116 : vector<7x128xf32>
    %cst_96 = arith.constant 0.000000e+00 : f32
    %118 = vector.broadcast %cst_96 : f32 to vector<7x128xf32>
    %119 = arith.maximumf %117, %118 : vector<7x128xf32>
    %120 = arith.truncf %119 : vector<7x128xf32> to vector<7x128xbf16>
    %121 = vector.extract_strided_slice %84 {offsets = [0, 0], sizes = [7, 128], strides = [1, 1]} : vector<7x256xf32> to vector<7x128xf32>
    %122 = vector.extract_strided_slice %84 {offsets = [0, 128], sizes = [7, 128], strides = [1, 1]} : vector<7x256xf32> to vector<7x128xf32>
    %123 = arith.maximumf %121, %122 : vector<7x128xf32>
    %124 = vector.extract_strided_slice %108 {offsets = [0, 0], sizes = [7, 128], strides = [1, 1]} : vector<7x256xf32> to vector<7x128xf32>
    %125 = vector.extract_strided_slice %108 {offsets = [0, 128], sizes = [7, 128], strides = [1, 1]} : vector<7x256xf32> to vector<7x128xf32>
    %126 = arith.maximumf %124, %125 : vector<7x128xf32>
    %127 = arith.maximumf %123, %126 : vector<7x128xf32>
    %128 = vector.broadcast %0 : vector<1x128xf32> to vector<7x128xf32>
    %129 = arith.addf %127, %128 : vector<7x128xf32>
    %cst_97 = arith.constant 0.000000e+00 : f32
    %130 = vector.broadcast %cst_97 : f32 to vector<7x128xf32>
    %131 = arith.maximumf %129, %130 : vector<7x128xf32>
    %132 = arith.truncf %131 : vector<7x128xf32> to vector<7x128xbf16>
    %133 = vector.extract_strided_slice %120 {offsets = [0, 0], sizes = [5, 128], strides = [1, 1]} : vector<7x128xbf16> to vector<5x128xbf16>
    %c0_98 = arith.constant 0 : index
    %c0_99 = arith.constant 0 : index
    %c0_100 = arith.constant 0 : index
    %134 = vector.load %arg7[%c0_98, %c0_99, %c0_100] : memref<5x128x256xbf16, #tpu.memory_space<vmem>>, vector<1x128x256xbf16>
    %135 = vector.shape_cast %134 : vector<1x128x256xbf16> to vector<128x256xbf16>
    %cst_101 = arith.constant dense<0.000000e+00> : vector<5x256xf32>
    %136 = tpu.matmul %133, %135, %cst_101 {dimension_numbers = #tpu.dot_dimension_numbers<[1], [0], [0], [1], [0, 0, 1, 1], [], []>} : vector<5x128xbf16>, vector<128x256xbf16>, vector<5x256xf32> -> vector<5x256xf32>
    %137 = vector.extract_strided_slice %132 {offsets = [0, 0], sizes = [5, 128], strides = [1, 1]} : vector<7x128xbf16> to vector<5x128xbf16>
    %c1_102 = arith.constant 1 : index
    %c0_103 = arith.constant 0 : index
    %c0_104 = arith.constant 0 : index
    %138 = vector.load %arg7[%c1_102, %c0_103, %c0_104] : memref<5x128x256xbf16, #tpu.memory_space<vmem>>, vector<1x128x256xbf16>
    %139 = vector.shape_cast %138 : vector<1x128x256xbf16> to vector<128x256xbf16>
    %cst_105 = arith.constant dense<0.000000e+00> : vector<5x256xf32>
    %140 = tpu.matmul %137, %139, %cst_105 {dimension_numbers = #tpu.dot_dimension_numbers<[1], [0], [0], [1], [0, 0, 1, 1], [], []>} : vector<5x128xbf16>, vector<128x256xbf16>, vector<5x256xf32> -> vector<5x256xf32>
    %141 = arith.addf %136, %140 : vector<5x256xf32>
    %142 = vector.extract_strided_slice %120 {offsets = [1, 0], sizes = [5, 128], strides = [1, 1]} : vector<7x128xbf16> to vector<5x128xbf16>
    %c2_106 = arith.constant 2 : index
    %c0_107 = arith.constant 0 : index
    %c0_108 = arith.constant 0 : index
    %143 = vector.load %arg7[%c2_106, %c0_107, %c0_108] : memref<5x128x256xbf16, #tpu.memory_space<vmem>>, vector<1x128x256xbf16>
    %144 = vector.shape_cast %143 : vector<1x128x256xbf16> to vector<128x256xbf16>
    %cst_109 = arith.constant dense<0.000000e+00> : vector<5x256xf32>
    %145 = tpu.matmul %142, %144, %cst_109 {dimension_numbers = #tpu.dot_dimension_numbers<[1], [0], [0], [1], [0, 0, 1, 1], [], []>} : vector<5x128xbf16>, vector<128x256xbf16>, vector<5x256xf32> -> vector<5x256xf32>
    %146 = arith.addf %141, %145 : vector<5x256xf32>
    %147 = vector.extract_strided_slice %132 {offsets = [1, 0], sizes = [5, 128], strides = [1, 1]} : vector<7x128xbf16> to vector<5x128xbf16>
    %c3_110 = arith.constant 3 : index
    %c0_111 = arith.constant 0 : index
    %c0_112 = arith.constant 0 : index
    %148 = vector.load %arg7[%c3_110, %c0_111, %c0_112] : memref<5x128x256xbf16, #tpu.memory_space<vmem>>, vector<1x128x256xbf16>
    %149 = vector.shape_cast %148 : vector<1x128x256xbf16> to vector<128x256xbf16>
    %cst_113 = arith.constant dense<0.000000e+00> : vector<5x256xf32>
    %150 = tpu.matmul %147, %149, %cst_113 {dimension_numbers = #tpu.dot_dimension_numbers<[1], [0], [0], [1], [0, 0, 1, 1], [], []>} : vector<5x128xbf16>, vector<128x256xbf16>, vector<5x256xf32> -> vector<5x256xf32>
    %151 = arith.addf %146, %150 : vector<5x256xf32>
    %152 = vector.extract_strided_slice %120 {offsets = [2, 0], sizes = [5, 128], strides = [1, 1]} : vector<7x128xbf16> to vector<5x128xbf16>
    %c4_114 = arith.constant 4 : index
    %c0_115 = arith.constant 0 : index
    %c0_116 = arith.constant 0 : index
    %153 = vector.load %arg7[%c4_114, %c0_115, %c0_116] : memref<5x128x256xbf16, #tpu.memory_space<vmem>>, vector<1x128x256xbf16>
    %154 = vector.shape_cast %153 : vector<1x128x256xbf16> to vector<128x256xbf16>
    %cst_117 = arith.constant dense<0.000000e+00> : vector<5x256xf32>
    %155 = tpu.matmul %152, %154, %cst_117 {dimension_numbers = #tpu.dot_dimension_numbers<[1], [0], [0], [1], [0, 0, 1, 1], [], []>} : vector<5x128xbf16>, vector<128x256xbf16>, vector<5x256xf32> -> vector<5x256xf32>
    %156 = arith.addf %151, %155 : vector<5x256xf32>
    %157 = vector.extract_strided_slice %132 {offsets = [0, 0], sizes = [5, 128], strides = [1, 1]} : vector<7x128xbf16> to vector<5x128xbf16>
    %c0_118 = arith.constant 0 : index
    %c0_119 = arith.constant 0 : index
    %c0_120 = arith.constant 0 : index
    %158 = vector.load %arg7[%c0_118, %c0_119, %c0_120] : memref<5x128x256xbf16, #tpu.memory_space<vmem>>, vector<1x128x256xbf16>
    %159 = vector.shape_cast %158 : vector<1x128x256xbf16> to vector<128x256xbf16>
    %cst_121 = arith.constant dense<0.000000e+00> : vector<5x256xf32>
    %160 = tpu.matmul %157, %159, %cst_121 {dimension_numbers = #tpu.dot_dimension_numbers<[1], [0], [0], [1], [0, 0, 1, 1], [], []>} : vector<5x128xbf16>, vector<128x256xbf16>, vector<5x256xf32> -> vector<5x256xf32>
    %161 = vector.extract_strided_slice %120 {offsets = [1, 0], sizes = [5, 128], strides = [1, 1]} : vector<7x128xbf16> to vector<5x128xbf16>
    %c1_122 = arith.constant 1 : index
    %c0_123 = arith.constant 0 : index
    %c0_124 = arith.constant 0 : index
    %162 = vector.load %arg7[%c1_122, %c0_123, %c0_124] : memref<5x128x256xbf16, #tpu.memory_space<vmem>>, vector<1x128x256xbf16>
    %163 = vector.shape_cast %162 : vector<1x128x256xbf16> to vector<128x256xbf16>
    %cst_125 = arith.constant dense<0.000000e+00> : vector<5x256xf32>
    %164 = tpu.matmul %161, %163, %cst_125 {dimension_numbers = #tpu.dot_dimension_numbers<[1], [0], [0], [1], [0, 0, 1, 1], [], []>} : vector<5x128xbf16>, vector<128x256xbf16>, vector<5x256xf32> -> vector<5x256xf32>
    %165 = arith.addf %160, %164 : vector<5x256xf32>
    %166 = vector.extract_strided_slice %132 {offsets = [1, 0], sizes = [5, 128], strides = [1, 1]} : vector<7x128xbf16> to vector<5x128xbf16>
    %c2_126 = arith.constant 2 : index
    %c0_127 = arith.constant 0 : index
    %c0_128 = arith.constant 0 : index
    %167 = vector.load %arg7[%c2_126, %c0_127, %c0_128] : memref<5x128x256xbf16, #tpu.memory_space<vmem>>, vector<1x128x256xbf16>
    %168 = vector.shape_cast %167 : vector<1x128x256xbf16> to vector<128x256xbf16>
    %cst_129 = arith.constant dense<0.000000e+00> : vector<5x256xf32>
    %169 = tpu.matmul %166, %168, %cst_129 {dimension_numbers = #tpu.dot_dimension_numbers<[1], [0], [0], [1], [0, 0, 1, 1], [], []>} : vector<5x128xbf16>, vector<128x256xbf16>, vector<5x256xf32> -> vector<5x256xf32>
    %170 = arith.addf %165, %169 : vector<5x256xf32>
    %171 = vector.extract_strided_slice %120 {offsets = [2, 0], sizes = [5, 128], strides = [1, 1]} : vector<7x128xbf16> to vector<5x128xbf16>
    %c3_130 = arith.constant 3 : index
    %c0_131 = arith.constant 0 : index
    %c0_132 = arith.constant 0 : index
    %172 = vector.load %arg7[%c3_130, %c0_131, %c0_132] : memref<5x128x256xbf16, #tpu.memory_space<vmem>>, vector<1x128x256xbf16>
    %173 = vector.shape_cast %172 : vector<1x128x256xbf16> to vector<128x256xbf16>
    %cst_133 = arith.constant dense<0.000000e+00> : vector<5x256xf32>
    %174 = tpu.matmul %171, %173, %cst_133 {dimension_numbers = #tpu.dot_dimension_numbers<[1], [0], [0], [1], [0, 0, 1, 1], [], []>} : vector<5x128xbf16>, vector<128x256xbf16>, vector<5x256xf32> -> vector<5x256xf32>
    %175 = arith.addf %170, %174 : vector<5x256xf32>
    %176 = vector.extract_strided_slice %132 {offsets = [2, 0], sizes = [5, 128], strides = [1, 1]} : vector<7x128xbf16> to vector<5x128xbf16>
    %c4_134 = arith.constant 4 : index
    %c0_135 = arith.constant 0 : index
    %c0_136 = arith.constant 0 : index
    %177 = vector.load %arg7[%c4_134, %c0_135, %c0_136] : memref<5x128x256xbf16, #tpu.memory_space<vmem>>, vector<1x128x256xbf16>
    %178 = vector.shape_cast %177 : vector<1x128x256xbf16> to vector<128x256xbf16>
    %cst_137 = arith.constant dense<0.000000e+00> : vector<5x256xf32>
    %179 = tpu.matmul %176, %178, %cst_137 {dimension_numbers = #tpu.dot_dimension_numbers<[1], [0], [0], [1], [0, 0, 1, 1], [], []>} : vector<5x128xbf16>, vector<128x256xbf16>, vector<5x256xf32> -> vector<5x256xf32>
    %180 = arith.addf %175, %179 : vector<5x256xf32>
    %181 = vector.extract_strided_slice %156 {offsets = [0, 0], sizes = [5, 128], strides = [1, 1]} : vector<5x256xf32> to vector<5x128xf32>
    %182 = vector.extract_strided_slice %156 {offsets = [0, 128], sizes = [5, 128], strides = [1, 1]} : vector<5x256xf32> to vector<5x128xf32>
    %183 = arith.maximumf %181, %182 : vector<5x128xf32>
    %184 = vector.extract_strided_slice %180 {offsets = [0, 0], sizes = [5, 128], strides = [1, 1]} : vector<5x256xf32> to vector<5x128xf32>
    %185 = vector.extract_strided_slice %180 {offsets = [0, 128], sizes = [5, 128], strides = [1, 1]} : vector<5x256xf32> to vector<5x128xf32>
    %186 = arith.maximumf %184, %185 : vector<5x128xf32>
    %187 = arith.maximumf %183, %186 : vector<5x128xf32>
    %188 = vector.broadcast %1 : vector<1x128xf32> to vector<5x128xf32>
    %189 = arith.addf %187, %188 : vector<5x128xf32>
    %cst_138 = arith.constant 0.000000e+00 : f32
    %190 = vector.broadcast %cst_138 : f32 to vector<5x128xf32>
    %191 = arith.maximumf %189, %190 : vector<5x128xf32>
    %192 = arith.truncf %191 : vector<5x128xf32> to vector<5x128xbf16>
    %193 = vector.extract_strided_slice %192 {offsets = [0, 0], sizes = [1, 128], strides = [1, 1]} : vector<5x128xbf16> to vector<1x128xbf16>
    %c0_139 = arith.constant 0 : index
    %c0_140 = arith.constant 0 : index
    %c0_141 = arith.constant 0 : index
    %194 = vector.load %arg9[%c0_139, %c0_140, %c0_141] : memref<5x128x256xbf16, #tpu.memory_space<vmem>>, vector<1x128x256xbf16>
    %195 = vector.shape_cast %194 : vector<1x128x256xbf16> to vector<128x256xbf16>
    %cst_142 = arith.constant dense<0.000000e+00> : vector<1x256xf32>
    %196 = tpu.matmul %193, %195, %cst_142 {dimension_numbers = #tpu.dot_dimension_numbers<[1], [0], [0], [1], [0, 0, 1, 1], [], []>} : vector<1x128xbf16>, vector<128x256xbf16>, vector<1x256xf32> -> vector<1x256xf32>
    %197 = vector.extract_strided_slice %192 {offsets = [1, 0], sizes = [1, 128], strides = [1, 1]} : vector<5x128xbf16> to vector<1x128xbf16>
    %c1_143 = arith.constant 1 : index
    %c0_144 = arith.constant 0 : index
    %c0_145 = arith.constant 0 : index
    %198 = vector.load %arg9[%c1_143, %c0_144, %c0_145] : memref<5x128x256xbf16, #tpu.memory_space<vmem>>, vector<1x128x256xbf16>
    %199 = vector.shape_cast %198 : vector<1x128x256xbf16> to vector<128x256xbf16>
    %cst_146 = arith.constant dense<0.000000e+00> : vector<1x256xf32>
    %200 = tpu.matmul %197, %199, %cst_146 {dimension_numbers = #tpu.dot_dimension_numbers<[1], [0], [0], [1], [0, 0, 1, 1], [], []>} : vector<1x128xbf16>, vector<128x256xbf16>, vector<1x256xf32> -> vector<1x256xf32>
    %201 = arith.addf %196, %200 : vector<1x256xf32>
    %202 = vector.extract_strided_slice %192 {offsets = [2, 0], sizes = [1, 128], strides = [1, 1]} : vector<5x128xbf16> to vector<1x128xbf16>
    %c2_147 = arith.constant 2 : index
    %c0_148 = arith.constant 0 : index
    %c0_149 = arith.constant 0 : index
    %203 = vector.load %arg9[%c2_147, %c0_148, %c0_149] : memref<5x128x256xbf16, #tpu.memory_space<vmem>>, vector<1x128x256xbf16>
    %204 = vector.shape_cast %203 : vector<1x128x256xbf16> to vector<128x256xbf16>
    %cst_150 = arith.constant dense<0.000000e+00> : vector<1x256xf32>
    %205 = tpu.matmul %202, %204, %cst_150 {dimension_numbers = #tpu.dot_dimension_numbers<[1], [0], [0], [1], [0, 0, 1, 1], [], []>} : vector<1x128xbf16>, vector<128x256xbf16>, vector<1x256xf32> -> vector<1x256xf32>
    %206 = arith.addf %201, %205 : vector<1x256xf32>
    %207 = vector.extract_strided_slice %192 {offsets = [3, 0], sizes = [1, 128], strides = [1, 1]} : vector<5x128xbf16> to vector<1x128xbf16>
    %c3_151 = arith.constant 3 : index
    %c0_152 = arith.constant 0 : index
    %c0_153 = arith.constant 0 : index
    %208 = vector.load %arg9[%c3_151, %c0_152, %c0_153] : memref<5x128x256xbf16, #tpu.memory_space<vmem>>, vector<1x128x256xbf16>
    %209 = vector.shape_cast %208 : vector<1x128x256xbf16> to vector<128x256xbf16>
    %cst_154 = arith.constant dense<0.000000e+00> : vector<1x256xf32>
    %210 = tpu.matmul %207, %209, %cst_154 {dimension_numbers = #tpu.dot_dimension_numbers<[1], [0], [0], [1], [0, 0, 1, 1], [], []>} : vector<1x128xbf16>, vector<128x256xbf16>, vector<1x256xf32> -> vector<1x256xf32>
    %211 = arith.addf %206, %210 : vector<1x256xf32>
    %212 = vector.extract_strided_slice %192 {offsets = [4, 0], sizes = [1, 128], strides = [1, 1]} : vector<5x128xbf16> to vector<1x128xbf16>
    %c4_155 = arith.constant 4 : index
    %c0_156 = arith.constant 0 : index
    %c0_157 = arith.constant 0 : index
    %213 = vector.load %arg9[%c4_155, %c0_156, %c0_157] : memref<5x128x256xbf16, #tpu.memory_space<vmem>>, vector<1x128x256xbf16>
    %214 = vector.shape_cast %213 : vector<1x128x256xbf16> to vector<128x256xbf16>
    %cst_158 = arith.constant dense<0.000000e+00> : vector<1x256xf32>
    %215 = tpu.matmul %212, %214, %cst_158 {dimension_numbers = #tpu.dot_dimension_numbers<[1], [0], [0], [1], [0, 0, 1, 1], [], []>} : vector<1x128xbf16>, vector<128x256xbf16>, vector<1x256xf32> -> vector<1x256xf32>
    %216 = arith.addf %211, %215 : vector<1x256xf32>
    %217 = arith.addf %216, %2 : vector<1x256xf32>
    %cst_159 = arith.constant 0.000000e+00 : f32
    %218 = vector.broadcast %cst_159 : f32 to vector<1x256xf32>
    %219 = arith.maximumf %217, %218 : vector<1x256xf32>
    %220 = arith.truncf %219 : vector<1x256xf32> to vector<1x256xbf16>
    %c0_160 = arith.constant 0 : index
    %c0_161 = arith.constant 0 : index
    %221 = vector.load %arg11[%c0_160, %c0_161] : memref<256x128xbf16, #tpu.memory_space<vmem>>, vector<256x128xbf16>
    %cst_162 = arith.constant dense<0.000000e+00> : vector<1x128xf32>
    %222 = tpu.matmul %220, %221, %cst_162 {dimension_numbers = #tpu.dot_dimension_numbers<[1], [0], [0], [1], [0, 0, 1, 1], [], []>} : vector<1x256xbf16>, vector<256x128xbf16>, vector<1x128xf32> -> vector<1x128xf32>
    %223 = arith.addf %222, %3 : vector<1x128xf32>
    %cst_163 = arith.constant 0.000000e+00 : f32
    %224 = vector.broadcast %cst_163 : f32 to vector<1x128xf32>
    %225 = arith.maximumf %223, %224 : vector<1x128xf32>
    %226 = arith.truncf %225 : vector<1x128xf32> to vector<1x128xbf16>
    %c0_164 = arith.constant 0 : index
    %c0_165 = arith.constant 0 : index
    %227 = vector.load %arg13[%c0_164, %c0_165] : memref<128x128xbf16, #tpu.memory_space<vmem>>, vector<128x128xbf16>
    %cst_166 = arith.constant dense<0.000000e+00> : vector<1x128xf32>
    %228 = tpu.matmul %226, %227, %cst_166 {dimension_numbers = #tpu.dot_dimension_numbers<[1], [0], [0], [1], [0, 0, 1, 1], [], []>} : vector<1x128xbf16>, vector<128x128xbf16>, vector<1x128xf32> -> vector<1x128xf32>
    %229 = arith.addf %228, %4 : vector<1x128xf32>
    %c0_167 = arith.constant 0 : index
    %c0_168 = arith.constant 0 : index
    %c0_169 = arith.constant 0 : index
    %230 = vector.load %arg15[%c0_167, %c0_168, %c0_169] : memref<1x1x128xf32, #tpu.memory_space<vmem>>, vector<1x1x128xf32>
    %231 = vector.shape_cast %230 : vector<1x1x128xf32> to vector<1x128xf32>
    %232 = vector.shape_cast %229 : vector<1x128xf32> to vector<1x1x128xf32>
    tpu.vector_store %arg15[%c0_167, %c0_168, %c0_169], %232 {strides = array<i32>} : memref<1x1x128xf32, #tpu.memory_space<vmem>>, vector<1x1x128xf32>,
    return
  }
  func.func @transform_0(%arg0: i32) -> (i32, i32, i32) {
    %c0_i32 = arith.constant 0 : i32
    %c0_i32_0 = arith.constant 0 : i32
    %c0_i32_1 = arith.constant 0 : i32
    return %arg0, %c0_i32, %c0_i32_0 : i32, i32, i32
  }
  func.func @transform_1(%arg0: i32) -> (i32, i32, i32) {
    %c0_i32 = arith.constant 0 : i32
    %c0_i32_0 = arith.constant 0 : i32
    %c0_i32_1 = arith.constant 0 : i32
    return %arg0, %c0_i32, %c0_i32_0 : i32, i32, i32
  }
  func.func @transform_2(%arg0: i32) -> (i32, i32, i32) {
    %c0_i32 = arith.constant 0 : i32
    %c0_i32_0 = arith.constant 0 : i32
    %c0_i32_1 = arith.constant 0 : i32
    return %arg0, %c0_i32, %c0_i32_0 : i32, i32, i32
  }
  func.func @transform_3(%arg0: i32) -> (i32, i32, i32) {
    %c0_i32 = arith.constant 0 : i32
    %c0_i32_0 = arith.constant 0 : i32
    %c0_i32_1 = arith.constant 0 : i32
    return %arg0, %c0_i32, %c0_i32_0 : i32, i32, i32
  }
  func.func @transform_4(%arg0: i32) -> (i32, i32, i32) {
    %c0_i32 = arith.constant 0 : i32
    %c0_i32_0 = arith.constant 0 : i32
    %c0_i32_1 = arith.constant 0 : i32
    %c0_i32_2 = arith.constant 0 : i32
    return %c0_i32, %c0_i32_0, %c0_i32_1 : i32, i32, i32
  }
  func.func @transform_5(%arg0: i32) -> (i32, i32) {
    %c0_i32 = arith.constant 0 : i32
    %c0_i32_0 = arith.constant 0 : i32
    %c0_i32_1 = arith.constant 0 : i32
    return %c0_i32, %c0_i32_0 : i32, i32
  }
  func.func @transform_6(%arg0: i32) -> (i32, i32, i32) {
    %c0_i32 = arith.constant 0 : i32
    %c0_i32_0 = arith.constant 0 : i32
    %c0_i32_1 = arith.constant 0 : i32
    %c0_i32_2 = arith.constant 0 : i32
    return %c0_i32, %c0_i32_0, %c0_i32_1 : i32, i32, i32
  }
  func.func @transform_7(%arg0: i32) -> (i32, i32) {
    %c0_i32 = arith.constant 0 : i32
    %c0_i32_0 = arith.constant 0 : i32
    %c0_i32_1 = arith.constant 0 : i32
    return %c0_i32, %c0_i32_0 : i32, i32
  }
  func.func @transform_8(%arg0: i32) -> (i32, i32, i32) {
    %c0_i32 = arith.constant 0 : i32
    %c0_i32_0 = arith.constant 0 : i32
    %c0_i32_1 = arith.constant 0 : i32
    %c0_i32_2 = arith.constant 0 : i32
    return %c0_i32, %c0_i32_0, %c0_i32_1 : i32, i32, i32
  }
  func.func @transform_9(%arg0: i32) -> (i32, i32) {
    %c0_i32 = arith.constant 0 : i32
    %c0_i32_0 = arith.constant 0 : i32
    %c0_i32_1 = arith.constant 0 : i32
    return %c0_i32, %c0_i32_0 : i32, i32
  }
  func.func @transform_10(%arg0: i32) -> (i32, i32) {
    %c0_i32 = arith.constant 0 : i32
    %c0_i32_0 = arith.constant 0 : i32
    %c0_i32_1 = arith.constant 0 : i32
    return %c0_i32, %c0_i32_0 : i32, i32
  }
  func.func @transform_11(%arg0: i32) -> (i32, i32) {
    %c0_i32 = arith.constant 0 : i32
    %c0_i32_0 = arith.constant 0 : i32
    %c0_i32_1 = arith.constant 0 : i32
    return %c0_i32, %c0_i32_0 : i32, i32
  }
  func.func @transform_12(%arg0: i32) -> (i32, i32) {
    %c0_i32 = arith.constant 0 : i32
    %c0_i32_0 = arith.constant 0 : i32
    %c0_i32_1 = arith.constant 0 : i32
    return %c0_i32, %c0_i32_0 : i32, i32
  }
  func.func @transform_13(%arg0: i32) -> (i32, i32) {
    %c0_i32 = arith.constant 0 : i32
    %c0_i32_0 = arith.constant 0 : i32
    %c0_i32_1 = arith.constant 0 : i32
    return %c0_i32, %c0_i32_0 : i32, i32
  }
  func.func @transform_14(%arg0: i32) -> (i32, i32, i32) {
    %c0_i32 = arith.constant 0 : i32
    %c0_i32_0 = arith.constant 0 : i32
    %c0_i32_1 = arith.constant 0 : i32
    return %arg0, %c0_i32, %c0_i32_0 : i32, i32, i32
  }
}

</mosaic_0001>

<bundles_post_ra>
// kernel: lenet_apply.1
= control target key start
LH: loop header
LB: loop body
LE: loop exit
PB: predicated region body
PF: predicated region fallthrough
CT: control target
= control target key end

     0   :  { %19 = vsyncpa [#allocation3], 0  ;;  %s6271_s0 = inlined_call_operand.vmem [shape: bf16[2,8,96], index: 0, kind: input, shape index: {}]   ;;  %s6272_s1 = inlined_call_operand.vmem [shape: bf16[2,8,96], index: 1, kind: input, shape index: {}]   ;;  %s6273_s2 = inlined_call_operand.vmem [shape: bf16[2,8,96], index: 2, kind: input, shape index: {}]   ;;  %s6274_s3 = inlined_call_operand.vmem [shape: bf16[2,8,96], index: 3, kind: input, shape index: {}]   ;;  %s6275_s4 = inlined_call_operand.hbm [shape: bf16[5,96,256], index: 4, kind: input, shape index: {}]   ;;  %s6276_s5 = inlined_call_operand.vmem [shape: f32[1,128], index: 5, kind: input, shape index: {}]   ;;  %s6277_s6 = inlined_call_operand.vmem [shape: bf16[5,128,256], index: 6, kind: input, shape index: {}]   ;;  %s6278_s7 = inlined_call_operand.vmem [shape: f32[1,128], index: 7, kind: input, shape index: {}]   ;;  %s6279_s8 = inlined_call_operand.vmem [shape: bf16[5,128,256], index: 8, kind: input, shape index: {}]   ;;  %s6280_s9 = inlined_call_operand.vmem [shape: f32[1,256], index: 9, kind: input, shape index: {}]   ;;  %s6281_s10 = inlined_call_operand.vmem [shape: bf16[256,128], index: 10, kind: input, shape index: {}]   ;;  %s6282_s11 = inlined_call_operand.vmem [shape: f32[1,128], index: 11, kind: input, shape index: {}]   ;;  %s6283_s12 = inlined_call_operand.vmem [shape: bf16[128,128], index: 12, kind: input, shape index: {}]   ;;  %s6284_s13 = inlined_call_operand.vmem [shape: f32[1,128], index: 13, kind: input, shape index: {}]   ;;  %s6285_s14 = inlined_call_operand.hbm [shape: f32[2,1,128], index: 14, kind: output, shape index: {}]  }
   0x1   :  { %20 = vsyncpa [#allocation4], 0 }
   0x2   :  { %22 = vsyncpa [#allocation4 + $0x1], 0  ;;  %s5040_s29 = smov 0   ;;  %s5042_s30 = smov 0  }
   0x3   :  { %s5044_s15 = smov 0   ;;  %s5046_s16 = smov 0  }
   0x4 LB: > { %6303 = sst [smem:[#allocation8_spill]] %s4952_s15  ;;  %s5061_s17 = sadd.s32 4294967295, %s4956_s16   ;;  %s4956_s16 = sphi %s5046_s16, %s6326_s16   ;;  %s4952_s15 = sphi %s5044_s15, %s6328_s15   ;;  %s4948_s30 = sphi %s5042_s30, %s6330_s30   ;;  %s4944_s29 = sphi %s5040_s29, %s6329_s29  }
   0x5   : > { %s3883_s18 = sadd.s32 4294967294, %s4956_s16   ;;  %s5065_s19 = sadd.s32 1, %s4956_s16  }
   0x6   : > { %6304 = sst [smem:[#allocation9_spill]] %s5065_s19  ;;  %s349_s20 = sadd.s32 1, %s4952_s15 }
   0x7   : > { %s346_s21 = ssub.s32 %s4956_s16, %s5065_s19  ;;  %p359_p0 = scmp.ne.s32.totalorder %s4952_s15, %s4948_s30 }
   0x8   : > { %p347_p1 = scmp.eq.s32.totalorder %s346_s21, 0  ;;  %p360_p2 = scmp.eq.s32.totalorder %s5061_s17, 1 }
   0x9   : > { %p365_p3 = scmp.ne.s32.totalorder %s4948_s30, %s4944_s29  ;;  %p366_p4 = scmp.eq.s32.totalorder %s3883_s18, 1 }
   0xa   : > { %s5076_s22 = scalar_select %p347_p1, %s4952_s15, %s349_s20  }
   0xb   : > { %p5078_p5 = por %p360_p2, %p359_p0  ;;  %p5082_p6 = por %p366_p4, %p365_p3 }
   0xc   : > { %6305 = sst [smem:[#allocation10_spill]] %s5076_s22  ;;  %p3884_p7 = scmp.ge.s32.totalorder %s4956_s16, 1 }
   0xd   : > { %s6306_s23 = scalar_select %p5078_p5, 1, 0 }
   0xe   : > { %s6307_s24 = scalar_select %p5082_p6, 1, 0 }
   0xf   : > { %p373_p8 = scmp.lt.s32.totalorder %s4956_s16, 3  ;;  %p6290_p9 = scmp.eq.s32.totalorder %s5061_s17, 0 }
  0x10   : > { %6308 = sst [smem:[#allocation11_spill]] %s6307_s24  ;;  %s4958_s26 = smov [#allocation2]  }
  0x11   : > { %p5089_p10 = pnand %p3884_p7, %p373_p8  ;;  %s385_s27 = sshll.u32 %s4958_s26, 4  ;;  %s386_s27 = int_to_ptr.vmem [resolvable:$true] %s385_s27 }
  0x12   : > { %s4862_s21 = scalar_lea.hbm %s6275_s4, 7680 }
  0x13   : > { %s6309_s25 = scalar_select %p5089_p10, 1, 0 }
  0x14   : > { %p4445_p11 = pneg %p5089_p10  ;;  %p4863_p13 = scmp.ne.s32.totalorder %s6275_s4, %s4862_s21 }
  0x15   : > { %p4869_p3 = scmp.lt.u32.totalorder %s4862_s21, %s6275_s4 }
  0x16   : > { %p5097_p12 = pnand %p6290_p9, %p4445_p11 }
  0x18   : > { %p4864_p0 = pneg %p5097_p12 }
  0x1a   : > { %p4865_p1 = pnand %p4864_p0, %p4863_p13 }
  0x1c   : > { %p4866_p2 = pneg %p4865_p1 }
  0x1e   : > { %p4871_p4 = pnand %p4869_p3, %p4866_p2 }
  0x20   : > { %4874 = shalt.err (!%p4871_p4)
}
  0x21   : > { %s4875_s24 = scalar_lea.vmem %s386_s27, 7680  ;;  %p4883_p9 = scmp.lt.s32.totalorder %s386_s27, %s386_s27 }
  0x22   : > { %p4876_p7 = scmp.ne.s32.totalorder %s386_s27, %s4875_s24  ;;  %p4884_p6 = scmp.lt.s32.totalorder %s4875_s24, %s4875_s24 }
  0x24   : > { %p4878_p8 = pnand %p4876_p7, %p4864_p0  ;;  %p4885_p5 = por %p4884_p6, %p4883_p9 }
  0x26   : > { %p4879_p11 = pneg %p4878_p8 }
  0x28   : > { %p4886_p10 = pnand %p4885_p5, %p4879_p11 }
  0x2a   : > { %4889 = shalt.err (!%p4886_p10)
}
  0x2b   : > { %s4959_s15 = smov 128   ;;  %s4960_s22 = smov 8  }
  0x2c   : > { %4448 = dma.hbm_to_vmem [thread:$0]  (!%p5097_p12), %s6275_s4, 7680, %s386_s27, [#allocation3], %s4959_s15, %s4959_s15, %s4960_s22  }
  0x2d   : > { %p6311_p13 = scmp.ne.s32.totalorder %s6309_s25, 0 }
  0x2f   : > { %456 = sbr.rel (%p6311_p13) target bundleno = 1634 (0x662), region = 76 }
  0x36   : > { %p6312_p1 = scmp.eq.s32.totalorder %s5061_s17, 0 }
  0x38   : > { %4935 = dma.done.wait (%p6312_p1), [#allocation3], 7680   ;;  %p6313_p0 = pmov %p6312_p1 }
  0x39   : > { %v6293_v0 = vmov 0   ;;  %v5125_v1 = vld [vmem:[#allocation2 + $0x64] ss:$8 sps:$4 sm:$0xff]   ;;  %v5130_v3 = vld [vmem:[#allocation2 + $0x60] ss:$8 sps:$4 sm:$0xff]   ;;  %p512_p5 = scmp.lt.s32.totalorder %s5061_s17, 1 }
  0x3a   : > { %4937 = vsyncadd (%p6313_p0), [#allocation3], 4294959616  ;;  %659 = vmatprep.mubr.bf16.mxu1 %v6293_v0  ;;  %763 = vmatprep.mubr.bf16.mxu0 %v6293_v0  ;;  %v5127_v2 = vld [vmem:[#allocation2 + $0x4] ss:$8 sps:$4 sm:$0xff]   ;;  %v5132_v4 = vld [vmem:[#allocation2] ss:$8 sps:$4 sm:$0xff]  }
  0x3b   : > { %627 = vmatprep.subr.bf16.mxu1 %v5125_v1  ;;  %731 = vmatprep.subr.bf16.mxu0 %v5127_v2  ;;  %v5135_v5 = vld [vmem:[#allocation2 + $0x74] ss:$8 sps:$4 sm:$0xff]   ;;  %v5141_v7 = vld [vmem:[#allocation2 + $0x70] ss:$8 sps:$4 sm:$0xff]   ;;  %v5147_v9 = vld [vmem:[#allocation2 + $0x84] ss:$8 sps:$4 sm:$0xff]  }
  0x3c   : > { %628 = vmatpush1.bf16.msra.mxu1 %v5130_v3  ;;  %732 = vmatpush1.bf16.msra.mxu0 %v5132_v4  ;;  %v5139_v6 = vld [vmem:[#allocation2 + $0x14] ss:$8 sps:$4 sm:$0xff]   ;;  %v5144_v8 = vld [vmem:[#allocation2 + $0x10] ss:$8 sps:$4 sm:$0xff]   ;;  %v5149_v10 = vld [vmem:[#allocation2 + $0x24] ss:$8 sps:$4 sm:$0xff]  }
  0x3d   : > { %629 = vmatprep.subr.bf16.mxu1 %v5135_v5  ;;  %733 = vmatprep.subr.bf16.mxu0 %v5139_v6  ;;  %v5151_v11 = vld [vmem:[#allocation2 + $0x80] ss:$8 sps:$4 sm:$0xff]   ;;  %v5157_v13 = vld [vmem:[#allocation2 + $0x94] ss:$8 sps:$4 sm:$0xff]   ;;  %v5164_v15 = vld [vmem:[#allocation2 + $0x90] ss:$8 sps:$4 sm:$0xff]  }
  0x3e   : > { %v5153_v12 = vld [vmem:[#allocation2 + $0x20] ss:$8 sps:$4 sm:$0xff]   ;;  %v5161_v14 = vld [vmem:[#allocation2 + $0x34] ss:$8 sps:$4 sm:$0xff]   ;;  %v5168_v16 = vld [vmem:[#allocation2 + $0x30] ss:$8 sps:$4 sm:$0xff]  }
  0x3f   : > { %v5170_v17 = vld [vmem:[#allocation2 + $0xa4] ss:$8 sps:$4 sm:$0xff]   ;;  %s513_s19 = scalar_select %p512_p5, %s5061_s17, 1  ;;  %v5177_v19 = vld [vmem:[#allocation2 + $0xa0] ss:$8 sps:$4 sm:$0xff]   ;;  %vm623_vm0 = vcmask 785408  }
  0x40   : > { %630 = vmatpush1.bf16.msra.mxu1 %v5141_v7  ;;  %734 = vmatpush1.bf16.msra.mxu0 %v5144_v8  ;;  %v5174_v18 = vld [vmem:[#allocation2 + $0x44] ss:$8 sps:$4 sm:$0xff]   ;;  %v5181_v20 = vld [vmem:[#allocation2 + $0x40] ss:$8 sps:$4 sm:$0xff]   ;;  %v5185_v21 = vld [vmem:[#allocation2 + $0xb4] ss:$8 sps:$4 sm:$0xff]  }
  0x41   : > { %631 = vmatprep.subr.bf16.mxu1 %v5147_v9  ;;  %735 = vmatprep.subr.bf16.mxu0 %v5149_v10  ;;  %v5187_v22 = vld [vmem:[#allocation2 + $0x54] ss:$8 sps:$4 sm:$0xff]   ;;  %s5189_s24 = sshll.u32 %s513_s19, 2  ;;  %v5193_v23 = vld [vmem:[#allocation2 + $0xb0] ss:$8 sps:$4 sm:$0xff]   ;;  %vm4963_vm1 = vmmov 0  }
  0x42   : > { %v5195_v24 = vld [vmem:[#allocation2 + $0x50] ss:$8 sps:$4 sm:$0xff]   ;;  %s519_s28 = scalar_lea.vmem %s6272_s1, %s5189_s24  ;;  %v5203_v25 = vld [vmem:[#allocation2 + $0xc4] ss:$8 sps:$4 sm:$0xff]   ;;  %s515_s15 = scalar_lea.vmem %s6271_s0, %s5189_s24  ;;  %v5215_v28 = vld [vmem:[#allocation2 + $0xc0] ss:$8 sps:$4 sm:$0xff]  }
  0x43   : > { %v5209_v26 = vld [vmem:[%s519_s28] sm:$0xf]  ;;  %v5219_v29 = vld [vmem:[#allocation2 + $0xd4] ss:$8 sps:$4 sm:$0xff]   ;;  %v5227_v30 = vld [vmem:[#allocation2 + $0xd0] ss:$8 sps:$4 sm:$0xff]   ;;  %s523_s20 = scalar_lea.vmem %s6273_s2, %s5189_s24  ;;  %s527_s27 = scalar_lea.vmem %s6274_s3, %s5189_s24 }
  0x44   : > { %632 = vmatpush1.bf16.msra.mxu1 %v5151_v11  ;;  %736 = vmatpush1.bf16.msra.mxu0 %v5153_v12  ;;  %v5213_v27 = vld [vmem:[%s515_s15] sm:$0xf]  ;;  %6314 = vst [vmem:[#allocation12_spill] sm:$0xff] %v5227_v30  ;;  %v5231_v31 = vld [vmem:[#allocation2 + $0xe4] ss:$8 sps:$4 sm:$0xff]   ;;  %s510_s21 = sand.u32 1, %s4948_s30  }
  0x45   : > { %633 = vmatprep.subr.bf16.mxu1 %v5157_v13  ;;  %737 = vmatprep.subr.bf16.mxu0 %v5161_v14  ;;  %6315 = vst [vmem:[#allocation13_spill] sm:$0xff] %v5231_v31  ;;  %v5237_v32 = vld [vmem:[#allocation2 + $0xe0] ss:$8 sps:$4 sm:$0xff]   ;;  %v5241_v33 = vld [vmem:[#allocation2 + $0xf4] ss:$8 sps:$4 sm:$0xff]   ;;  %v3945_v61 = vcombine.low %v5213_v27, %v5213_v27  ;;  %s4291_s22 = sshll.u32 %s5061_s17, 4 }
  0x46   : > { %6316 = vst [vmem:[#allocation14_spill] sm:$0xff] %v5237_v32  ;;  %6317 = vst [vmem:[#allocation15_spill] sm:$0xff] %v5241_v33  ;;  %v5245_v34 = vld [vmem:[#allocation2 + $0xf0] ss:$8 sps:$4 sm:$0xff]   ;;  %v5249_v35 = vld [vmem:[#allocation2 + $0x104] ss:$8 sps:$4 sm:$0xff]  }
  0x47   : > { %v5253_v36 = vld [vmem:[#allocation2 + $0x100] ss:$8 sps:$4 sm:$0xff]   ;;  %v5257_v37 = vld [vmem:[#allocation2 + $0x114] ss:$8 sps:$4 sm:$0xff]   ;;  %v5259_v38 = vld [vmem:[#allocation2 + $0x110] ss:$8 sps:$4 sm:$0xff]  }
  0x48   : > { %634 = vmatpush1.bf16.msra.mxu1 %v5164_v15  ;;  %738 = vmatpush1.bf16.msra.mxu0 %v5168_v16  ;;  %v5261_v39 = vld [vmem:[#allocation2 + $0x124] ss:$8 sps:$4 sm:$0xff]   ;;  %v5271_v40 = vld [vmem:[%s523_s20] sm:$0xf]  ;;  %v5275_v42 = vld [vmem:[#allocation2 + $0x134] ss:$8 sps:$4 sm:$0xff]  }
  0x49   : > { %635 = vmatprep.subr.bf16.mxu1 %v5170_v17  ;;  %739 = vmatprep.subr.bf16.mxu0 %v5174_v18  ;;  %v5273_v41 = vld [vmem:[#allocation2 + $0x120] ss:$8 sps:$4 sm:$0xff]   ;;  %v5281_v43 = vld [vmem:[#allocation2 + $0x130] ss:$8 sps:$4 sm:$0xff]   ;;  %v5287_v44 = vld [vmem:[#allocation2 + $0x144] ss:$8 sps:$4 sm:$0xff]  }
  0x4a   : > { %v5293_v45 = vld [vmem:[#allocation2 + $0x140] ss:$8 sps:$4 sm:$0xff]   ;;  %v5297_v46 = vld [vmem:[#allocation2 + $0x154] ss:$8 sps:$4 sm:$0xff]   ;;  %v5303_v47 = vld [vmem:[#allocation2 + $0x150] ss:$8 sps:$4 sm:$0xff]  }
  0x4b   : > { %v5305_v48 = vld [vmem:[#allocation2 + $0x164] ss:$8 sps:$4 sm:$0xff]   ;;  %v5311_v49 = vld [vmem:[#allocation2 + $0x160] ss:$8 sps:$4 sm:$0xff]   ;;  %v5313_v50 = vld [vmem:[#allocation2 + $0x174] ss:$8 sps:$4 sm:$0xff]  }
  0x4c   : > { %636 = vmatpush1.bf16.msra.mxu1 %v5177_v19  ;;  %740 = vmatpush1.bf16.msra.mxu0 %v5181_v20  ;;  %v5319_v51 = vld [vmem:[#allocation2 + $0x170] ss:$8 sps:$4 sm:$0xff]   ;;  %v5321_v52 = vld [vmem:[#allocation2 + $0x184] ss:$8 sps:$4 sm:$0xff]   ;;  %v5331_v53 = vld [vmem:[%s527_s27] sm:$0xf]  ;;  %s6229_s27 = scalar_lea.hbm %s6285_s14, %s4291_s22 }
  0x4d   : > { %637 = vmatprep.subr.bf16.mxu1 %v5185_v21  ;;  %741 = vmatprep.subr.bf16.mxu0 %v5187_v22  ;;  %v5333_v54 = vld [vmem:[#allocation2 + $0x180] ss:$8 sps:$4 sm:$0xff]   ;;  %v5335_v55 = vld [vmem:[#allocation2 + $0x194] ss:$8 sps:$4 sm:$0xff]   ;;  %v5341_v56 = vld [vmem:[#allocation2 + $0x190] ss:$8 sps:$4 sm:$0xff]  }
  0x4e   : > { %v5347_v57 = vld [vmem:[#allocation2 + $0x1a4] ss:$8 sps:$4 sm:$0xff]   ;;  %v5353_v58 = vld [vmem:[#allocation2 + $0x1a0] ss:$8 sps:$4 sm:$0xff]   ;;  %v5357_v59 = vld [vmem:[#allocation2 + $0x1b4] ss:$8 sps:$4 sm:$0xff]  }
  0x4f   : > { %v5363_v60 = vld [vmem:[#allocation2 + $0x1b0] ss:$8 sps:$4 sm:$0xff]   ;;  %v5367_v62 = vld [vmem:[#allocation2 + $0x1c4] ss:$8 sps:$4 sm:$0xff]   ;;  %v5373_v63 = vld [vmem:[#allocation2 + $0x1c0] ss:$8 sps:$4 sm:$0xff]  }
  0x50   : > { %638 = vmatpush1.bf16.msra.mxu1 %v5193_v23  ;;  %742 = vmatpush1.bf16.msra.mxu0 %v5195_v24  ;;  %s511_s18 = scalar_lea.vmem [#allocation5], %s510_s21  ;;  %s3768_s24 = scalar_lea.sflag [#allocation4], %s510_s21 }
  0x51   : > { %848 = vmatprep.subr.bf16.mxu0 %v5203_v25  ;;  %1139 = vmatprep.subr.bf16.mxu1 %v5125_v1  ;;  %s3780_s20 = sshll.u32 %s511_s18, 4  ;;  %p6323_p9 = scmp.ne.s32.totalorder %s6306_s23, 0  ;;  %s6231_s20 = int_to_ptr.vmem [resolvable:$true] %s3780_s20 }
  0x52   : > { %s4890_s17 = scalar_lea.vmem %s6231_s20, 16  ;;  %s4964_s28 = smov [#allocation5]  }
  0x53   : > { %3905 = vmatmul.mubr.msk.bf16.vlgmr.msra.gmra.mrb[0].mxu1 %vm623_vm0, %v5209_v26  ;;  %3918 = vmatmul.mubr.msk.bf16.vlgmr.msra.gmra.mrb[0].mxu0 %vm623_vm0, %v5213_v27  ;;  %v5381_v27 = vld [vmem:[#allocation2 + $0x1d0] ss:$8 sps:$4 sm:$0xff]   ;;  %p4891_p6 = scmp.ne.s32.totalorder %s6231_s20, %s4890_s17  ;;  %s4894_s26 = sshll.u32 %s4964_s28, 4  ;;  %s4895_s26 = int_to_ptr.vmem [resolvable:$false] %s4894_s26 }
  0x54   : > { %849 = vmatpush1.bf16.msra.mxu0 %v5215_v28  ;;  %1140 = vmatpush1.bf16.msra.mxu1 %v5130_v3  ;;  %s4896_s15 = scalar_lea.vmem %s4895_s26, 32  ;;  %p4897_p2 = scmp.lt.s32.totalorder %s6231_s20, %s4895_s26 }
  0x55   : > { %850 = vmatprep.subr.bf16.mxu0 %v5219_v29  ;;  %1141 = vmatprep.subr.bf16.mxu1 %v5135_v5  ;;  %p4892_p10 = pnand %p4891_p6, %p6323_p9  ;;  %p4898_p3 = scmp.lt.s32.totalorder %s4896_s15, %s4890_s17 }
  0x56   : > { %880 = vmatprep.mubr.bf16.mxu0 %v6293_v0  ;;  %1171 = vmatprep.mubr.bf16.mxu1 %v6293_v0 }
  0x57   : > { %p4893_p12 = pneg %p4892_p10  ;;  %p4899_p4 = por %p4898_p3, %p4897_p2 }
  0x58   : > { %851 = vmatpush1.bf16.msra.mxu0 %v5227_v30  ;;  %1142 = vmatpush1.bf16.msra.mxu1 %v5141_v7 }
  0x59   : > { %852 = vmatprep.subr.bf16.mxu0 %v5231_v31  ;;  %1143 = vmatprep.subr.bf16.mxu1 %v5147_v9  ;;  %p4900_p7 = pnand %p4899_p4, %p4893_p12 }
  0x5c   : > { %853 = vmatpush1.bf16.msra.mxu0 %v5237_v32  ;;  %1144 = vmatpush1.bf16.msra.mxu1 %v5151_v11 }
  0x5d   : > { %854 = vmatprep.subr.bf16.mxu0 %v5241_v33  ;;  %1145 = vmatprep.subr.bf16.mxu1 %v5157_v13 }
  0x60   : > { %855 = vmatpush1.bf16.msra.mxu0 %v5245_v34  ;;  %1146 = vmatpush1.bf16.msra.mxu1 %v5164_v15 }
  0x61   : > { %856 = vmatprep.subr.bf16.mxu0 %v5249_v35  ;;  %1147 = vmatprep.subr.bf16.mxu1 %v5170_v17 }
  0x64   : > { %857 = vmatpush1.bf16.msra.mxu0 %v5253_v36  ;;  %1148 = vmatpush1.bf16.msra.mxu1 %v5177_v19 }
  0x65   : > { %858 = vmatprep.subr.bf16.mxu0 %v5257_v37  ;;  %1149 = vmatprep.subr.bf16.mxu1 %v5185_v21 }
  0x68   : > { %859 = vmatpush1.bf16.msra.mxu0 %v5259_v38  ;;  %1150 = vmatpush1.bf16.msra.mxu1 %v5193_v23 }
  0x69   : > { %967 = vmatprep.subr.bf16.mxu0 %v5261_v39  ;;  %1180 = vmatprep.subr.bf16.mxu1 %v5127_v2 }
  0x6b   : > { %3931 = vmatmul.mubr.msk.bf16.vlgmr.msra.gmra.mrb[0].mxu0 %vm623_vm0, %v5271_v40  ;;  %3959 = vmatmul.mubr.msk.bf16.vlgmr.msra.gmra.mrb[4].mxu1 %vm623_vm0, %v5271_v40 }
  0x6c   : > { %968 = vmatpush1.bf16.msra.mxu0 %v5273_v41  ;;  %1181 = vmatpush1.bf16.msra.mxu1 %v5132_v4 }
  0x6d   : > { %969 = vmatprep.subr.bf16.mxu0 %v5275_v42  ;;  %1182 = vmatprep.subr.bf16.mxu1 %v5139_v6 }
  0x6e   : > { %999 = vmatprep.mubr.bf16.mxu0 %v6293_v0  ;;  %1212 = vmatprep.mubr.bf16.mxu1 %v6293_v0 }
  0x70   : > { %970 = vmatpush1.bf16.msra.mxu0 %v5281_v43  ;;  %1183 = vmatpush1.bf16.msra.mxu1 %v5144_v8 }
  0x71   : > { %971 = vmatprep.subr.bf16.mxu0 %v5287_v44  ;;  %1184 = vmatprep.subr.bf16.mxu1 %v5149_v10 }
  0x74   : > { %972 = vmatpush1.bf16.msra.mxu0 %v5293_v45  ;;  %1185 = vmatpush1.bf16.msra.mxu1 %v5153_v12 }
  0x75   : > { %973 = vmatprep.subr.bf16.mxu0 %v5297_v46  ;;  %1186 = vmatprep.subr.bf16.mxu1 %v5161_v14 }
  0x78   : > { %974 = vmatpush1.bf16.msra.mxu0 %v5303_v47  ;;  %1187 = vmatpush1.bf16.msra.mxu1 %v5168_v16 }
  0x79   : > { %975 = vmatprep.subr.bf16.mxu0 %v5305_v48  ;;  %1188 = vmatprep.subr.bf16.mxu1 %v5174_v18 }
  0x7c   : > { %976 = vmatpush1.bf16.msra.mxu0 %v5311_v49  ;;  %1189 = vmatpush1.bf16.msra.mxu1 %v5181_v20 }
  0x7d   : > { %977 = vmatprep.subr.bf16.mxu0 %v5313_v50  ;;  %1190 = vmatprep.subr.bf16.mxu1 %v5187_v22 }
  0x80   : > { %978 = vmatpush1.bf16.msra.mxu0 %v5319_v51  ;;  %1191 = vmatpush1.bf16.msra.mxu1 %v5195_v24 }
  0x81   : > { %1096 = vmatprep.subr.bf16.mxu0 %v5321_v52  ;;  %1221 = vmatprep.subr.bf16.mxu1 %v5203_v25 }
  0x83   : > { %3944 = vmatmul.mubr.msk.bf16.vlgmr.msra.gmra.mrb[0].mxu0 %vm623_vm0, %v5331_v53  ;;  %3960 = vmatmul.mubr.msk.bf16.vlgmr.msra.gmra.mrb[4].mxu1 %vm623_vm0, %v5209_v26 }
  0x84   : > { %1097 = vmatpush1.bf16.msra.mxu0 %v5333_v54  ;;  %1222 = vmatpush1.bf16.msra.mxu1 %v5215_v28 }
  0x85   : > { %1098 = vmatprep.subr.bf16.mxu0 %v5335_v55  ;;  %1223 = vmatprep.subr.bf16.mxu1 %v5219_v29 }
  0x86   : > { %1128 = vmatprep.mubr.bf16.mxu0 %v6293_v0  ;;  %1253 = vmatprep.mubr.bf16.mxu1 %v6293_v0  ;;  %v1029_v0 = vshll.u32 %v3945_v61, 16 }
  0x88   : > { %1099 = vmatpush1.bf16.msra.mxu0 %v5341_v56  ;;  %1224 = vmatpush1.bf16.msra.mxu1 %v5227_v30  ;;  %v5375_v30 = vld [vmem:[#allocation2 + $0x1d4] ss:$8 sps:$4 sm:$0xff]  }
  0x89   : > { %1100 = vmatprep.subr.bf16.mxu0 %v5347_v57  ;;  %1225 = vmatprep.subr.bf16.mxu1 %v5231_v31  ;;  %v1031_v31 = vrot.slane %v1029_v0, 1  ;;  %v6318_v0 = vmov 0  }
  0x8c   : > { %1101 = vmatpush1.bf16.msra.mxu0 %v5353_v58  ;;  %1226 = vmatpush1.bf16.msra.mxu1 %v5237_v32  ;;  %v1027_v32 = vshrl.u32 %v3945_v61, 16 }
  0x8d   : > { %1102 = vmatprep.subr.bf16.mxu0 %v5357_v59  ;;  %1227 = vmatprep.subr.bf16.mxu1 %v5241_v33 }
  0x8e   : > { %v5387_v33 = vor.u32 %v1031_v31, %v1027_v32  ;;  %v4596_v31 = vld [vmem:[%s6277_s6 + $0xa4] ss:$8 sps:$4 sm:$0xff]   ;;  %v4594_v32 = vld [vmem:[%s6277_s6 + $0xa0] ss:$8 sps:$4 sm:$0xff]  }
  0x90   : > { %1103 = vmatpush1.bf16.msra.mxu0 %v5363_v60  ;;  %1228 = vmatpush1.bf16.msra.mxu1 %v5245_v34 }
  0x91   : > { %1104 = vmatprep.subr.bf16.mxu0 %v5367_v62  ;;  %1229 = vmatprep.subr.bf16.mxu1 %v5249_v35 }
  0x94   : > { %1105 = vmatpush1.bf16.msra.mxu0 %v5373_v63  ;;  %1230 = vmatpush1.bf16.msra.mxu1 %v5253_v36 }
  0x95   : > { %1106 = vmatprep.subr.bf16.mxu0 %v5375_v30  ;;  %1231 = vmatprep.subr.bf16.mxu1 %v5257_v37 }
  0x98   : > { %1107 = vmatpush1.bf16.msra.mxu0 %v5381_v27  ;;  %1232 = vmatpush1.bf16.msra.mxu1 %v5259_v38 }
  0x99   : > { %1264 = vmatprep.subr.bf16.mxu1 %v5261_v39  ;;  %1363 = vmatprep.subr.bf16.mxu0 %v5125_v1  ;;  %v3963_v1 = vcombine.low %v5209_v26, %v5209_v26  ;;  %v6322_v26 = vld [vmem:[#allocation15_spill] sm:$0xff] }
  0x9b   : > { %3958 = vmatmul.mubr.msk.bf16.vlgmr.msra.gmra.mrb[0].mxu0 %vm623_vm0, %v5387_v33  ;;  %3961 = vmatmul.mubr.msk.bf16.vlgmr.msra.gmra.mrb[4].mxu1 %vm623_vm0, %v5331_v53 }
  0x9c   : > { %1265 = vmatpush1.bf16.msra.mxu1 %v5273_v41  ;;  %1364 = vmatpush1.bf16.msra.mxu0 %v5130_v3  ;;  %v1311_v3 = vshrl.u32 %v3963_v1, 16 }
  0x9d   : > { %1266 = vmatprep.subr.bf16.mxu1 %v5275_v42  ;;  %1365 = vmatprep.subr.bf16.mxu0 %v5135_v5 }
  0x9e   : > { %1296 = vmatprep.mubr.bf16.mxu1 %v6318_v0  ;;  %1395 = vmatprep.mubr.bf16.mxu0 %v6318_v0 }
  0xa0   : > { %1267 = vmatpush1.bf16.msra.mxu1 %v5281_v43  ;;  %1366 = vmatpush1.bf16.msra.mxu0 %v5141_v7 }
  0xa1   : > { %1268 = vmatprep.subr.bf16.mxu1 %v5287_v44  ;;  %1367 = vmatprep.subr.bf16.mxu0 %v5147_v9 }
  0xa4   : > { %1269 = vmatpush1.bf16.msra.mxu1 %v5293_v45  ;;  %1368 = vmatpush1.bf16.msra.mxu0 %v5151_v11 }
  0xa5   : > { %1270 = vmatprep.subr.bf16.mxu1 %v5297_v46  ;;  %1369 = vmatprep.subr.bf16.mxu0 %v5157_v13 }
  0xa8   : > { %1271 = vmatpush1.bf16.msra.mxu1 %v5303_v47  ;;  %1370 = vmatpush1.bf16.msra.mxu0 %v5164_v15 }
  0xa9   : > { %1272 = vmatprep.subr.bf16.mxu1 %v5305_v48  ;;  %1371 = vmatprep.subr.bf16.mxu0 %v5170_v17 }
  0xac   : > { %1273 = vmatpush1.bf16.msra.mxu1 %v5311_v49  ;;  %1372 = vmatpush1.bf16.msra.mxu0 %v5177_v19 }
  0xad   : > { %1274 = vmatprep.subr.bf16.mxu1 %v5313_v50  ;;  %1373 = vmatprep.subr.bf16.mxu0 %v5185_v21 }
  0xb0   : > { %1275 = vmatpush1.bf16.msra.mxu1 %v5319_v51  ;;  %1374 = vmatpush1.bf16.msra.mxu0 %v5193_v23 }
  0xb1   : > { %1320 = vmatprep.subr.bf16.mxu1 %v5321_v52  ;;  %1404 = vmatprep.subr.bf16.mxu0 %v5127_v2  ;;  %v1313_v2 = vshll.u32 %v3963_v1, 16 }
  0xb3   : > { %3962 = vmatmul.mubr.msk.bf16.vlgmr.msra.gmra.mrb[4].mxu1 %vm623_vm0, %v5387_v33  ;;  %3965 = vmatmul.mubr.msk.bf16.vlgmr.msra.gmra.mrb[4].mxu0 %vm623_vm0, %v5331_v53 }
  0xb4   : > { %1321 = vmatpush1.bf16.msra.mxu1 %v5333_v54  ;;  %1405 = vmatpush1.bf16.msra.mxu0 %v5132_v4  ;;  %v1315_v4 = vrot.slane %v1313_v2, 1 }
  0xb5   : > { %1322 = vmatprep.subr.bf16.mxu1 %v5335_v55  ;;  %1406 = vmatprep.subr.bf16.mxu0 %v5139_v6 }
  0xb6   : > { %1352 = vmatprep.mubr.bf16.mxu1 %v6318_v0  ;;  %1436 = vmatprep.mubr.bf16.mxu0 %v6318_v0  ;;  %v5451_v6 = vor.u32 %v1315_v4, %v1311_v3 }
  0xb8   : > { %1323 = vmatpush1.bf16.msra.mxu1 %v5341_v56  ;;  %1407 = vmatpush1.bf16.msra.mxu0 %v5144_v8  ;;  %v4852_v8 = vld [vmem:[#allocation2 + $0x64] ss:$8 sps:$4 sm:$0xff]  }
  0xb9   : > { %1324 = vmatprep.subr.bf16.mxu1 %v5347_v57  ;;  %1408 = vmatprep.subr.bf16.mxu0 %v5149_v10  ;;  %v4853_v10 = vld [vmem:[#allocation2 + $0x60] ss:$8 sps:$4 sm:$0xff]  }
  0xbc   : > { %1325 = vmatpush1.bf16.msra.mxu1 %v5353_v58  ;;  %1409 = vmatpush1.bf16.msra.mxu0 %v5153_v12  ;;  %v6319_v12 = vld [vmem:[#allocation12_spill] sm:$0xff] }
  0xbd   : > { %1326 = vmatprep.subr.bf16.mxu1 %v5357_v59  ;;  %1410 = vmatprep.subr.bf16.mxu0 %v5161_v14  ;;  %v6320_v14 = vld [vmem:[#allocation13_spill] sm:$0xff] }
  0xc0   : > { %1327 = vmatpush1.bf16.msra.mxu1 %v5363_v60  ;;  %1411 = vmatpush1.bf16.msra.mxu0 %v5168_v16  ;;  %v6321_v16 = vld [vmem:[#allocation14_spill] sm:$0xff] }
  0xc1   : > { %1328 = vmatprep.subr.bf16.mxu1 %v5367_v62  ;;  %1412 = vmatprep.subr.bf16.mxu0 %v5174_v18 }
  0xc4   : > { %1329 = vmatpush1.bf16.msra.mxu1 %v5373_v63  ;;  %1413 = vmatpush1.bf16.msra.mxu0 %v5181_v20 }
  0xc5   : > { %1330 = vmatprep.subr.bf16.mxu1 %v5375_v30  ;;  %1414 = vmatprep.subr.bf16.mxu0 %v5187_v22 }
  0xc8   : > { %1331 = vmatpush1.bf16.msra.mxu1 %v5381_v27  ;;  %1415 = vmatpush1.bf16.msra.mxu0 %v5195_v24 }
  0xc9   : > { %1445 = vmatprep.subr.bf16.mxu0 %v5203_v25  ;;  %1587 = vmatprep.subr.bf16.mxu1 %v4852_v8 }
  0xcb   : > { %3964 = vmatmul.mubr.msk.bf16.vlgmr.msra.gmra.mrb[4].mxu1 %vm623_vm0, %v5451_v6  ;;  %3966 = vmatmul.mubr.msk.bf16.vlgmr.msra.gmra.mrb[4].mxu0 %vm623_vm0, %v5271_v40 }
  0xcc   : > { %1446 = vmatpush1.bf16.msra.mxu0 %v5215_v28  ;;  %1588 = vmatpush1.bf16.msra.mxu1 %v4853_v10 }
  0xcd   : > { %1447 = vmatprep.subr.bf16.mxu0 %v5219_v29  ;;  %1589 = vmatprep.subr.bf16.mxu1 %v5135_v5  ;;  %v4854_v5 = vld [vmem:[#allocation2 + $0x4] ss:$8 sps:$4 sm:$0xff]  }
  0xce   : > { %1477 = vmatprep.mubr.bf16.mxu0 %v6318_v0  ;;  %1619 = vmatprep.mubr.bf16.mxu1 %v6318_v0 }
  0xd0   : > { %1448 = vmatpush1.bf16.msra.mxu0 %v6319_v12  ;;  %1590 = vmatpush1.bf16.msra.mxu1 %v5141_v7  ;;  %v4855_v7 = vld [vmem:[#allocation2] ss:$8 sps:$4 sm:$0xff]  }
  0xd1   : > { %1449 = vmatprep.subr.bf16.mxu0 %v6320_v14  ;;  %1591 = vmatprep.subr.bf16.mxu1 %v5147_v9  ;;  %v4856_v9 = vld [vmem:[#allocation2 + $0x14] ss:$8 sps:$4 sm:$0xff]  }
  0xd4   : > { %1450 = vmatpush1.bf16.msra.mxu0 %v6321_v16  ;;  %1592 = vmatpush1.bf16.msra.mxu1 %v5151_v11  ;;  %v4857_v11 = vld [vmem:[#allocation2 + $0x10] ss:$8 sps:$4 sm:$0xff]  }
  0xd5   : > { %1451 = vmatprep.subr.bf16.mxu0 %v6322_v26  ;;  %1593 = vmatprep.subr.bf16.mxu1 %v5157_v13  ;;  %v4858_v13 = vld [vmem:[#allocation2 + $0x24] ss:$8 sps:$4 sm:$0xff]  }
  0xd8   : > { %1452 = vmatpush1.bf16.msra.mxu0 %v5245_v34  ;;  %1594 = vmatpush1.bf16.msra.mxu1 %v5164_v15  ;;  %v4859_v15 = vld [vmem:[#allocation2 + $0x20] ss:$8 sps:$4 sm:$0xff]  }
  0xd9   : > { %1453 = vmatprep.subr.bf16.mxu0 %v5249_v35  ;;  %1595 = vmatprep.subr.bf16.mxu1 %v5170_v17  ;;  %v4860_v17 = vld [vmem:[#allocation2 + $0x34] ss:$8 sps:$4 sm:$0xff]  }
  0xdc   : > { %1454 = vmatpush1.bf16.msra.mxu0 %v5253_v36  ;;  %1596 = vmatpush1.bf16.msra.mxu1 %v5177_v19  ;;  %v4861_v19 = vld [vmem:[#allocation2 + $0x30] ss:$8 sps:$4 sm:$0xff]  }
  0xdd   : > { %1455 = vmatprep.subr.bf16.mxu0 %v5257_v37  ;;  %1597 = vmatprep.subr.bf16.mxu1 %v5185_v21 }
  0xe0   : > { %1456 = vmatpush1.bf16.msra.mxu0 %v5259_v38  ;;  %1598 = vmatpush1.bf16.msra.mxu1 %v5193_v23 }
  0xe1   : > { %1488 = vmatprep.subr.bf16.mxu0 %v5261_v39  ;;  %1628 = vmatprep.subr.bf16.mxu1 %v4854_v5  ;;  %v4620_v5 = vld [vmem:[%s6277_s6 + $0x24] ss:$8 sps:$4 sm:$0xff]  }
  0xe3   : > { %3967 = vmatmul.mubr.msk.bf16.vlgmr.msra.gmra.mrb[4].mxu0 %vm623_vm0, %v5387_v33  ;;  %3971 = vmatmul.mubr.msk.bf16.vlgmr.msra.gmra.mrb[8].mxu1 %vm623_vm0, %v5387_v33  ;;  %v4599_v33 = vld [vmem:[%s6277_s6 + $0xb4] ss:$8 sps:$4 sm:$0xff]  }
  0xe4   : > { %1489 = vmatpush1.bf16.msra.mxu0 %v5273_v41  ;;  %1629 = vmatpush1.bf16.msra.mxu1 %v4855_v7  ;;  %v4618_v7 = vld [vmem:[%s6277_s6 + $0x20] ss:$8 sps:$4 sm:$0xff]  }
  0xe5   : > { %1490 = vmatprep.subr.bf16.mxu0 %v5275_v42  ;;  %1630 = vmatprep.subr.bf16.mxu1 %v4856_v9  ;;  %v4623_v9 = vld [vmem:[%s6277_s6 + $0x34] ss:$8 sps:$4 sm:$0xff]  }
  0xe6   : > { %1520 = vmatprep.mubr.bf16.mxu0 %v6318_v0  ;;  %1660 = vmatprep.mubr.bf16.mxu1 %v6318_v0 }
  0xe8   : > { %1491 = vmatpush1.bf16.msra.mxu0 %v5281_v43  ;;  %1631 = vmatpush1.bf16.msra.mxu1 %v4857_v11  ;;  %v4621_v11 = vld [vmem:[%s6277_s6 + $0x30] ss:$8 sps:$4 sm:$0xff]  }
  0xe9   : > { %1492 = vmatprep.subr.bf16.mxu0 %v5287_v44  ;;  %1632 = vmatprep.subr.bf16.mxu1 %v4858_v13  ;;  %v4626_v13 = vld [vmem:[%s6277_s6 + $0x44] ss:$8 sps:$4 sm:$0xff]  }
  0xec   : > { %1493 = vmatpush1.bf16.msra.mxu0 %v5293_v45  ;;  %1633 = vmatpush1.bf16.msra.mxu1 %v4859_v15  ;;  %v4624_v15 = vld [vmem:[%s6277_s6 + $0x40] ss:$8 sps:$4 sm:$0xff]  }
  0xed   : > { %1494 = vmatprep.subr.bf16.mxu0 %v5297_v46  ;;  %1634 = vmatprep.subr.bf16.mxu1 %v4860_v17  ;;  %v4629_v17 = vld [vmem:[%s6277_s6 + $0x54] ss:$8 sps:$4 sm:$0xff]  }
  0xf0   : > { %1495 = vmatpush1.bf16.msra.mxu0 %v5303_v47  ;;  %1635 = vmatpush1.bf16.msra.mxu1 %v4861_v19  ;;  %v4627_v19 = vld [vmem:[%s6277_s6 + $0x50] ss:$8 sps:$4 sm:$0xff]  }
  0xf1   : > { %1496 = vmatprep.subr.bf16.mxu0 %v5305_v48  ;;  %1636 = vmatprep.subr.bf16.mxu1 %v5174_v18  ;;  %v3969_v18 = vcombine.low %v5271_v40, %v5271_v40  ;;  %v4603_v40 = vld [vmem:[%s6277_s6 + $0xd0] ss:$8 sps:$4 sm:$0xff]  }
  0xf3   : > { %v1535_v21 = vshrl.u32 %v3969_v18, 16 }
  0xf4   : > { %1497 = vmatpush1.bf16.msra.mxu0 %v5311_v49  ;;  %1637 = vmatpush1.bf16.msra.mxu1 %v5181_v20  ;;  %v1537_v20 = vshll.u32 %v3969_v18, 16  ;;  %v5682_v18 = vld [vmem:[%s6277_s6 + $0x64] ss:$8 sps:$4 sm:$0xff]  }
  0xf5   : > { %1498 = vmatprep.subr.bf16.mxu0 %v5313_v50  ;;  %1638 = vmatprep.subr.bf16.mxu1 %v5187_v22 }
  0xf6   : > { %v1539_v22 = vrot.slane %v1537_v20, 1  ;;  %v5687_v20 = vld [vmem:[%s6277_s6 + $0x60] ss:$8 sps:$4 sm:$0xff]  }
  0xf8   : > { %1499 = vmatpush1.bf16.msra.mxu0 %v5319_v51  ;;  %1639 = vmatpush1.bf16.msra.mxu1 %v5195_v24  ;;  %v1540_v23 = vor.u32 %v1539_v22, %v1535_v21  ;;  %v5538_v24 = vld [vmem:[%s6277_s6 + $0x84] ss:$8 sps:$4 sm:$0xff]   ;;  %v5693_v21 = vld [vmem:[%s6277_s6 + $0x74] ss:$8 sps:$4 sm:$0xff]   ;;  %v5699_v22 = vld [vmem:[%s6277_s6 + $0x70] ss:$8 sps:$4 sm:$0xff]  }
  0xf9   : > { %1544 = vmatprep.subr.bf16.mxu0 %v5321_v52  ;;  %1669 = vmatprep.subr.bf16.mxu1 %v5203_v25  ;;  %v5550_v25 = vld [vmem:[%s6277_s6 + $0x80] ss:$8 sps:$4 sm:$0xff]  }
  0xfb   : > { %3968 = vmatmul.mubr.msk.bf16.vlgmr.msra.gmra.mrb[4].mxu0 %vm623_vm0, %v5451_v6  ;;  %3972 = vmatmul.mubr.msk.bf16.vlgmr.msra.gmra.mrb[8].mxu1 %vm623_vm0, %v5331_v53 }
  0xfc   : > { %1545 = vmatpush1.bf16.msra.mxu0 %v5333_v54  ;;  %1670 = vmatpush1.bf16.msra.mxu1 %v5215_v28  ;;  %v5557_v28 = vld [vmem:[%s6277_s6 + $0x94] ss:$8 sps:$4 sm:$0xff]  }
  0xfd   : > { %1546 = vmatprep.subr.bf16.mxu0 %v5335_v55  ;;  %1671 = vmatprep.subr.bf16.mxu1 %v5219_v29  ;;  %v4591_v29 = vld [vmem:[%s6277_s6 + $0x90] ss:$8 sps:$4 sm:$0xff]  }
  0xfe   : > { %1576 = vmatprep.mubr.bf16.mxu0 %v6318_v0  ;;  %1701 = vmatprep.mubr.bf16.mxu1 %v6318_v0 }
 0x100   : > { %1547 = vmatpush1.bf16.msra.mxu0 %v5341_v56  ;;  %1672 = vmatpush1.bf16.msra.mxu1 %v6319_v12  ;;  %v4612_v12 = vld [vmem:[%s6277_s6] ss:$8 sps:$4 sm:$0xff]  }
 0x101   : > { %1548 = vmatprep.subr.bf16.mxu0 %v5347_v57  ;;  %1673 = vmatprep.subr.bf16.mxu1 %v6320_v14 }
 0x104   : > { %1549 = vmatpush1.bf16.msra.mxu0 %v5353_v58  ;;  %1674 = vmatpush1.bf16.msra.mxu1 %v6321_v16  ;;  %v4617_v16 = vld [vmem:[%s6277_s6 + $0x14] ss:$8 sps:$4 sm:$0xff]  }
 0x105   : > { %1550 = vmatprep.subr.bf16.mxu0 %v5357_v59  ;;  %1675 = vmatprep.subr.bf16.mxu1 %v6322_v26  ;;  %v4615_v26 = vld [vmem:[%s6277_s6 + $0x10] ss:$8 sps:$4 sm:$0xff]  }
 0x108   : > { %1551 = vmatpush1.bf16.msra.mxu0 %v5363_v60  ;;  %1676 = vmatpush1.bf16.msra.mxu1 %v5245_v34  ;;  %v4597_v34 = vld [vmem:[%s6277_s6 + $0xb0] ss:$8 sps:$4 sm:$0xff]  }
 0x109   : > { %1552 = vmatprep.subr.bf16.mxu0 %v5367_v62  ;;  %1677 = vmatprep.subr.bf16.mxu1 %v5249_v35  ;;  %v4602_v35 = vld [vmem:[%s6277_s6 + $0xc4] ss:$8 sps:$4 sm:$0xff]  }
 0x10c   : > { %1553 = vmatpush1.bf16.msra.mxu0 %v5373_v63  ;;  %1678 = vmatpush1.bf16.msra.mxu1 %v5253_v36  ;;  %v4600_v36 = vld [vmem:[%s6277_s6 + $0xc0] ss:$8 sps:$4 sm:$0xff]  }
 0x10d   : > { %1554 = vmatprep.subr.bf16.mxu0 %v5375_v30  ;;  %1679 = vmatprep.subr.bf16.mxu1 %v5257_v37  ;;  %v4605_v37 = vld [vmem:[%s6277_s6 + $0xd4] ss:$8 sps:$4 sm:$0xff]  }
 0x110   : > { %1555 = vmatpush1.bf16.msra.mxu0 %v5381_v27  ;;  %1680 = vmatpush1.bf16.msra.mxu1 %v5259_v38 }
 0x111   : > { %1712 = vmatprep.subr.bf16.mxu1 %v5261_v39  ;;  %1942 = vmatprep.subr.bf16.mxu0 %v5538_v24 }
 0x113   : > { %3970 = vmatmul.mubr.msk.bf16.vlgmr.msra.gmra.mrb[4].mxu0 %vm623_vm0, %v1540_v23  ;;  %3973 = vmatmul.mubr.msk.bf16.vlgmr.msra.gmra.mrb[8].mxu1 %vm623_vm0, %v5451_v6 }
 0x114   : > { %1713 = vmatpush1.bf16.msra.mxu1 %v5273_v41  ;;  %1744 = vmatprep.mubr.bf16.mxu1 %v6318_v0 }
 0x115   : > { %1714 = vmatprep.subr.bf16.mxu1 %v5275_v42  ;;  %1943 = vmatpush1.bf16.msra.mxu0 %v5550_v25  ;;  %v4608_v42 = vld [vmem:[%s6277_s6 + $0xe4] ss:$8 sps:$4 sm:$0xff]  }
 0x116   : > { %1944 = vmatprep.subr.bf16.mxu0 %v5557_v28  ;;  %1974 = vmatprep.mubr.bf16.mxu0 %v6318_v0 }
 0x118   : > { %1715 = vmatpush1.bf16.msra.mxu1 %v5281_v43 }
 0x119   : > { %1716 = vmatprep.subr.bf16.mxu1 %v5287_v44  ;;  %1945 = vmatpush1.bf16.msra.mxu0 %v4591_v29  ;;  %v4606_v44 = vld [vmem:[%s6277_s6 + $0xe0] ss:$8 sps:$4 sm:$0xff]  }
 0x11a   : > { %1946 = vmatprep.subr.bf16.mxu0 %v4596_v31 }
 0x11c   : > { %1717 = vmatpush1.bf16.msra.mxu1 %v5293_v45  ;;  %v4611_v45 = vld [vmem:[%s6277_s6 + $0xf4] ss:$8 sps:$4 sm:$0xff]  }
 0x11d   : > { %1718 = vmatprep.subr.bf16.mxu1 %v5297_v46  ;;  %1947 = vmatpush1.bf16.msra.mxu0 %v4594_v32  ;;  %v4609_v46 = vld [vmem:[%s6277_s6 + $0xf0] ss:$8 sps:$4 sm:$0xff]  }
 0x11e   : > { %1948 = vmatprep.subr.bf16.mxu0 %v4599_v33 }
 0x120   : > { %1719 = vmatpush1.bf16.msra.mxu1 %v5303_v47  ;;  %v3975_v47 = vcombine.low %v5331_v53, %v5331_v53 }
 0x121   : > { %1720 = vmatprep.subr.bf16.mxu1 %v5305_v48  ;;  %1949 = vmatpush1.bf16.msra.mxu0 %v4597_v34 }
 0x122   : > { %1950 = vmatprep.subr.bf16.mxu0 %v4602_v35  ;;  %v1761_v48 = vshll.u32 %v3975_v47, 16 }
 0x124   : > { %1721 = vmatpush1.bf16.msra.mxu1 %v5311_v49  ;;  %v1759_v49 = vshrl.u32 %v3975_v47, 16  ;;  %v4645_v47 = vld [vmem:[%s6277_s6 + $0x130] ss:$8 sps:$4 sm:$0xff]  }
 0x125   : > { %1722 = vmatprep.subr.bf16.mxu1 %v5313_v50  ;;  %1951 = vmatpush1.bf16.msra.mxu0 %v4600_v36  ;;  %v1763_v50 = vrot.slane %v1761_v48, 1  ;;  %v4650_v48 = vld [vmem:[%s6277_s6 + $0x144] ss:$8 sps:$4 sm:$0xff]  }
 0x126   : > { %v661_v38 = vpop.f32.mrb[0].mxu1  ;;  %1952 = vmatprep.subr.bf16.mxu0 %v4605_v37 }
 0x127   : > { %v663_v39 = vpop.f32.mrb[1].mxu1 }
 0x128   : > { %v665_v41 = vpop.f32.mrb[2].mxu1  ;;  %1723 = vmatpush1.bf16.msra.mxu1 %v5319_v51  ;;  %v1764_v51 = vor.u32 %v1763_v50, %v1759_v49  ;;  %v4648_v49 = vld [vmem:[%s6277_s6 + $0x140] ss:$8 sps:$4 sm:$0xff]   ;;  %v4653_v50 = vld [vmem:[%s6277_s6 + $0x154] ss:$8 sps:$4 sm:$0xff]  }
 0x129   : > { %v666_v43 = vpop.f32.mrb[3].mxu1  ;;  %1768 = vmatprep.subr.bf16.mxu1 %v5321_v52  ;;  %1953 = vmatpush1.bf16.msra.mxu0 %v4603_v40 }
 0x12a   : > { %1954 = vmatprep.subr.bf16.mxu0 %v4608_v42  ;;  %v4639_v43 = vld [vmem:[%s6277_s6 + $0x110] ss:$8 sps:$4 sm:$0xff]  }
 0x12b   : > { %3974 = vmatmul.mubr.msk.bf16.vlgmr.msra.gmra.mrb[8].mxu1 %vm623_vm0, %v1540_v23  ;;  %v5705_v23 = vld [vmem:[%s6277_s6 + $0x104] ss:$8 sps:$4 sm:$0xff]  }
 0x12c   : > { %1769 = vmatpush1.bf16.msra.mxu1 %v5333_v54  ;;  %1800 = vmatprep.mubr.bf16.mxu1 %v6318_v0 }
 0x12d   : > { %1770 = vmatprep.subr.bf16.mxu1 %v5335_v55  ;;  %1955 = vmatpush1.bf16.msra.mxu0 %v4606_v44 }
 0x12e   : > { %1956 = vmatprep.subr.bf16.mxu0 %v4611_v45 }
 0x130   : > { %1771 = vmatpush1.bf16.msra.mxu1 %v5341_v56 }
 0x131   : > { %1772 = vmatprep.subr.bf16.mxu1 %v5347_v57  ;;  %1957 = vmatpush1.bf16.msra.mxu0 %v4609_v46 }
 0x134   : > { %1773 = vmatpush1.bf16.msra.mxu1 %v5353_v58 }
 0x135   : > { %1774 = vmatprep.subr.bf16.mxu1 %v5357_v59 }
 0x138   : > { %1775 = vmatpush1.bf16.msra.mxu1 %v5363_v60 }
 0x139   : > { %1776 = vmatprep.subr.bf16.mxu1 %v5367_v62 }
 0x13c   : > { %1777 = vmatpush1.bf16.msra.mxu1 %v5373_v63  ;;  %v3977_v63 = vld [vmem:[%s6276_s5] ss:$0 sm:$0xff] }
 0x13d   : > { %1778 = vmatprep.subr.bf16.mxu1 %v5375_v30  ;;  %v4614_v30 = vld [vmem:[%s6277_s6 + $0x4] ss:$8 sps:$4 sm:$0xff]  }
 0x13e   : > { %2063 = vmatprep.subr.bf16.mxu0 %v4614_v30 }
 0x140   : > { %1779 = vmatpush1.bf16.msra.mxu1 %v5381_v27 }
 0x141   : > { %2543 = vmatprep.subr.bf16.mxu1 %v5538_v24 }
 0x143   : > { %3976 = vmatmul.mubr.msk.bf16.vlgmr.msra.gmra.mrb[8].mxu1 %vm623_vm0, %v1764_v51  ;;  %v4651_v51 = vld [vmem:[%s6277_s6 + $0x150] ss:$8 sps:$4 sm:$0xff]  }
 0x144   : > { %2544 = vmatpush1.bf16.msra.mxu1 %v5550_v25  ;;  %2575 = vmatprep.mubr.bf16.mxu1 %v6318_v0 }
 0x145   : > { %2545 = vmatprep.subr.bf16.mxu1 %v5557_v28 }
 0x148   : > { %2546 = vmatpush1.bf16.msra.mxu1 %v4591_v29 }
 0x149   : > { %2547 = vmatprep.subr.bf16.mxu1 %v4596_v31 }
 0x14c   : > { %2548 = vmatpush1.bf16.msra.mxu1 %v4594_v32 }
 0x14d   : > { %2549 = vmatprep.subr.bf16.mxu1 %v4599_v33 }
 0x150   : > { %2550 = vmatpush1.bf16.msra.mxu1 %v4597_v34 }
 0x151   : > { %2551 = vmatprep.subr.bf16.mxu1 %v4602_v35 }
 0x154   : > { %2552 = vmatpush1.bf16.msra.mxu1 %v4600_v36 }
 0x155   : > { %2553 = vmatprep.subr.bf16.mxu1 %v4605_v37 }
 0x158   : > { %2554 = vmatpush1.bf16.msra.mxu1 %v4603_v40  ;;  %v4636_v40 = vld [vmem:[%s6277_s6 + $0x100] ss:$8 sps:$4 sm:$0xff]  }
 0x159   : > { %2555 = vmatprep.subr.bf16.mxu1 %v4608_v42  ;;  %v4641_v42 = vld [vmem:[%s6277_s6 + $0x114] ss:$8 sps:$4 sm:$0xff]  }
 0x15c   : > { %2556 = vmatpush1.bf16.msra.mxu1 %v4606_v44  ;;  %v4644_v44 = vld [vmem:[%s6277_s6 + $0x124] ss:$8 sps:$4 sm:$0xff]  }
 0x15d   : > { %2557 = vmatprep.subr.bf16.mxu1 %v4611_v45  ;;  %v4642_v45 = vld [vmem:[%s6277_s6 + $0x120] ss:$8 sps:$4 sm:$0xff]  }
 0x160   : > { %2558 = vmatpush1.bf16.msra.mxu1 %v4609_v46  ;;  %v4647_v46 = vld [vmem:[%s6277_s6 + $0x134] ss:$8 sps:$4 sm:$0xff]  }
 0x161   : > { %2584 = vmatprep.subr.bf16.mxu1 %v4614_v30  ;;  %v4656_v30 = vld [vmem:[%s6277_s6 + $0x164] ss:$8 sps:$4 sm:$0xff]  }
 0x16e   : > { %v1130_v52 = vpop.f32.mrb[0].mxu0 }
 0x16f   : > { %v4345_v53 = vadd.f32 %v1130_v52, %v661_v38  ;;  %v1132_v54 = vpop.f32.mrb[1].mxu0  ;;  %v4654_v52 = vld [vmem:[%s6277_s6 + $0x160] ss:$8 sps:$4 sm:$0xff]  }
 0x170   : > { %v4346_v55 = vadd.f32 %v1132_v54, %v663_v39  ;;  %v1134_v56 = vpop.f32.mrb[2].mxu0 }
 0x171   : > { %v1135_v57 = vpop.f32.mrb[3].mxu0 }
 0x172   : > { %v1811_v58 = vmax.f32 %v4345_v53, %v4346_v55  ;;  %v4659_v53 = vld [vmem:[%s6277_s6 + $0x174] ss:$8 sps:$4 sm:$0xff]   ;;  %v4657_v55 = vld [vmem:[%s6277_s6 + $0x170] ss:$8 sps:$4 sm:$0xff]   ;;  %v4662_v57 = vld [vmem:[%s6277_s6 + $0x184] ss:$8 sps:$4 sm:$0xff]  }
 0x19e   : > { %v1354_v59 = vpop.f32.mrb[4].mxu1 }
 0x19f   : > { %v1356_v60 = vpop.f32.mrb[5].mxu1 }
 0x1a0   : > { %v1812_v61 = vmax.f32 %v1354_v59, %v1356_v60  ;;  %v1358_v62 = vpop.f32.mrb[6].mxu1  ;;  %v4660_v59 = vld [vmem:[%s6277_s6 + $0x180] ss:$8 sps:$4 sm:$0xff]  }
 0x1a1   : > { %v1359_v27 = vpop.f32.mrb[7].mxu1  ;;  %v4663_v62 = vld [vmem:[%s6277_s6 + $0x190] ss:$8 sps:$4 sm:$0xff]  }
 0x1a2   : > { %v1813_v1 = vmax.f32 %v1811_v58, %v1812_v61  ;;  %v4665_v61 = vld [vmem:[%s6277_s6 + $0x194] ss:$8 sps:$4 sm:$0xff]   ;;  %v4666_v27 = vld [vmem:[%s6277_s6 + $0x1a0] ss:$8 sps:$4 sm:$0xff]  }
 0x1a4   : > { %v1820_v2 = vadd.f32 %v3977_v63, %v1813_v1  ;;  %v4671_v1 = vld [vmem:[%s6277_s6 + $0x1b4] ss:$8 sps:$4 sm:$0xff]  }
 0x1a6   : > { %v1821_v3 = vmax.f32 %v1820_v2, 0.0  ;;  %v4669_v2 = vld [vmem:[%s6277_s6 + $0x1b0] ss:$8 sps:$4 sm:$0xff]  }
 0x1a8   : > { %v5638_v4 = vpack.c.bf16 %v1821_v3, %v1821_v3  ;;  %v4674_v3 = vld [vmem:[%s6277_s6 + $0x1c4] ss:$8 sps:$4 sm:$0xff]  }
 0x1aa   : > { %v2124_v6 = vshll.u32 %v5638_v4, 16  ;;  %v2122_v8 = vshrl.u32 %v5638_v4, 16 }
 0x1ac   : > { %v2126_v10 = vrot.slane %v2124_v6, 1  ;;  %v4672_v6 = vld [vmem:[%s6277_s6 + $0x1c0] ss:$8 sps:$4 sm:$0xff]  }
 0x1ae   : > { %v5645_v14 = vor.u32 %v2126_v10, %v2122_v8  ;;  %v4677_v8 = vld [vmem:[%s6277_s6 + $0x1d4] ss:$8 sps:$4 sm:$0xff]   ;;  %v4675_v10 = vld [vmem:[%s6277_s6 + $0x1d0] ss:$8 sps:$4 sm:$0xff]  }
 0x1b0   : > { %2576 = vmatmul.mubr.bf16.vlgmr.msra.gmra.mrb[12].mxu1 %v5645_v14 }
 0x1b1   : > { %2585 = vmatpush1.bf16.msra.mxu1 %v4612_v12  ;;  %2616 = vmatprep.mubr.bf16.mxu1 %v6318_v0 }
 0x1b2   : > { %2586 = vmatprep.subr.bf16.mxu1 %v4617_v16 }
 0x1b5   : > { %2587 = vmatpush1.bf16.msra.mxu1 %v4615_v26 }
 0x1b6   : > { %2588 = vmatprep.subr.bf16.mxu1 %v4620_v5 }
 0x1b9   : > { %2589 = vmatpush1.bf16.msra.mxu1 %v4618_v7 }
 0x1ba   : > { %2590 = vmatprep.subr.bf16.mxu1 %v4623_v9 }
 0x1bd   : > { %2591 = vmatpush1.bf16.msra.mxu1 %v4621_v11 }
 0x1be   : > { %2592 = vmatprep.subr.bf16.mxu1 %v4626_v13 }
 0x1c1   : > { %2593 = vmatpush1.bf16.msra.mxu1 %v4624_v15 }
 0x1c2   : > { %2594 = vmatprep.subr.bf16.mxu1 %v4629_v17 }
 0x1c5   : > { %2595 = vmatpush1.bf16.msra.mxu1 %v4627_v19 }
 0x1c6   : > { %2596 = vmatprep.subr.bf16.mxu1 %v5682_v18 }
 0x1c9   : > { %2597 = vmatpush1.bf16.msra.mxu1 %v5687_v20 }
 0x1ca   : > { %2598 = vmatprep.subr.bf16.mxu1 %v5693_v21 }
 0x1cd   : > { %2599 = vmatpush1.bf16.msra.mxu1 %v5699_v22 }
 0x1ce   : > { %2625 = vmatprep.subr.bf16.mxu1 %v5705_v23 }
 0x1e6   : > { %v1578_v24 = vpop.f32.mrb[4].mxu0 }
 0x1e7   : > { %v1580_v25 = vpop.f32.mrb[5].mxu0 }
 0x1e8   : > { %v1823_v28 = vmax.f32 %v1578_v24, %v1580_v25  ;;  %v1582_v29 = vpop.f32.mrb[6].mxu0  ;;  %v4704_v24 = vld [vmem:[%s6277_s6 + $0x264] ss:$8 sps:$4 sm:$0xff]   ;;  %v4702_v25 = vld [vmem:[%s6277_s6 + $0x260] ss:$8 sps:$4 sm:$0xff]  }
 0x1e9   : > { %v1583_v31 = vpop.f32.mrb[7].mxu0  ;;  %v4705_v29 = vld [vmem:[%s6277_s6 + $0x270] ss:$8 sps:$4 sm:$0xff]  }
 0x216   : > { %v1802_v32 = vpop.f32.mrb[8].mxu1 }
 0x217   : > { %v1804_v33 = vpop.f32.mrb[9].mxu1 }
 0x218   : > { %v1824_v34 = vmax.f32 %v1802_v32, %v1804_v33  ;;  %v1806_v35 = vpop.f32.mrb[10].mxu1  ;;  %v4708_v32 = vld [vmem:[%s6279_s8] ss:$8 sps:$4 sm:$0xff]   ;;  %v4710_v33 = vld [vmem:[%s6279_s8 + $0x4] ss:$8 sps:$4 sm:$0xff]  }
 0x219   : > { %v1807_v36 = vpop.f32.mrb[11].mxu1  ;;  %v4713_v35 = vld [vmem:[%s6279_s8 + $0x84] ss:$8 sps:$4 sm:$0xff]  }
 0x21a   : > { %v1825_v37 = vmax.f32 %v1823_v28, %v1824_v34  ;;  %v4707_v28 = vld [vmem:[%s6277_s6 + $0x274] ss:$8 sps:$4 sm:$0xff]   ;;  %v4711_v34 = vld [vmem:[%s6279_s8 + $0x80] ss:$8 sps:$4 sm:$0xff]  }
 0x21b   : > { %v4719_v36 = vld [vmem:[%s6279_s8 + $0x94] ss:$8 sps:$4 sm:$0xff]  }
 0x21c   : > { %v1826_v38 = vadd.f32 %v3977_v63, %v1825_v37  ;;  %v4668_v63 = vld [vmem:[%s6277_s6 + $0x1a4] ss:$8 sps:$4 sm:$0xff]   ;;  %v4714_v37 = vld [vmem:[%s6279_s8 + $0x10] ss:$8 sps:$4 sm:$0xff]  }
 0x21e   : > { %v1827_v39 = vmax.f32 %v1826_v38, 0.0  ;;  %v4717_v38 = vld [vmem:[%s6279_s8 + $0x90] ss:$8 sps:$4 sm:$0xff]  }
 0x220   : > { %v5712_v41 = vpack.c.bf16 %v1827_v39, %v1827_v39  ;;  %v4722_v39 = vld [vmem:[%s6279_s8 + $0x24] ss:$8 sps:$4 sm:$0xff]  }
 0x222   : > { %1975 = vmatmul.mubr.bf16.vlgmr.msra.gmra.mrb[8].mxu0 %v5712_v41  ;;  %2617 = vmatmul.mubr.bf16.vlgmr.msra.gmra.mrb[12].mxu1 %v5712_v41  ;;  %v2272_v54 = vshll.u32 %v5712_v41, 16  ;;  %v2270_v58 = vshrl.u32 %v5712_v41, 16  ;;  %v2712_v31 = vrot.slane %v5712_v41, 1  ;;  %v4720_v41 = vld [vmem:[%s6279_s8 + $0x20] ss:$8 sps:$4 sm:$0xff]  }
 0x223   : > { %2064 = vmatpush1.bf16.msra.mxu0 %v4612_v12  ;;  %2626 = vmatpush1.bf16.msra.mxu1 %v4636_v40  ;;  %v4680_v12 = vld [vmem:[%s6277_s6 + $0x1e4] ss:$8 sps:$4 sm:$0xff]  }
 0x224   : > { %2065 = vmatprep.subr.bf16.mxu0 %v4617_v16  ;;  %2627 = vmatprep.subr.bf16.mxu1 %v4641_v42  ;;  %v2274_v56 = vrot.slane %v2272_v54, 1  ;;  %v4678_v16 = vld [vmem:[%s6277_s6 + $0x1e0] ss:$8 sps:$4 sm:$0xff]   ;;  %v4746_v54 = vld [vmem:[%s6279_s8 + $0x64] ss:$8 sps:$4 sm:$0xff]  }
 0x225   : > { %2095 = vmatprep.mubr.bf16.mxu0 %v6318_v0  ;;  %2657 = vmatprep.mubr.bf16.mxu1 %v6318_v0 }
 0x226   : > { %v5773_v60 = vor.u32 %v2274_v56, %v2270_v58  ;;  %v4749_v56 = vld [vmem:[%s6279_s8 + $0xe4] ss:$8 sps:$4 sm:$0xff]   ;;  %v4752_v58 = vld [vmem:[%s6279_s8 + $0x74] ss:$8 sps:$4 sm:$0xff]  }
 0x227   : > { %2066 = vmatpush1.bf16.msra.mxu0 %v4615_v26  ;;  %2628 = vmatpush1.bf16.msra.mxu1 %v4639_v43  ;;  %v4683_v26 = vld [vmem:[%s6277_s6 + $0x1f4] ss:$8 sps:$4 sm:$0xff]  }
 0x228   : > { %2067 = vmatprep.subr.bf16.mxu0 %v4620_v5  ;;  %2629 = vmatprep.subr.bf16.mxu1 %v4644_v44  ;;  %v4681_v5 = vld [vmem:[%s6277_s6 + $0x1f0] ss:$8 sps:$4 sm:$0xff]  }
 0x22b   : > { %2068 = vmatpush1.bf16.msra.mxu0 %v4618_v7  ;;  %2630 = vmatpush1.bf16.msra.mxu1 %v4642_v45  ;;  %v4686_v7 = vld [vmem:[%s6277_s6 + $0x204] ss:$8 sps:$4 sm:$0xff]  }
 0x22c   : > { %2069 = vmatprep.subr.bf16.mxu0 %v4623_v9  ;;  %2631 = vmatprep.subr.bf16.mxu1 %v4647_v46  ;;  %v4684_v9 = vld [vmem:[%s6277_s6 + $0x200] ss:$8 sps:$4 sm:$0xff]  }
 0x22f   : > { %2070 = vmatpush1.bf16.msra.mxu0 %v4621_v11  ;;  %2632 = vmatpush1.bf16.msra.mxu1 %v4645_v47  ;;  %v2418_v11 = vrot.slane %v5638_v4, 1 }
 0x230   : > { %2071 = vmatprep.subr.bf16.mxu0 %v4626_v13  ;;  %2633 = vmatprep.subr.bf16.mxu1 %v4650_v48  ;;  %v4689_v13 = vld [vmem:[%s6277_s6 + $0x214] ss:$8 sps:$4 sm:$0xff]  }
 0x233   : > { %2072 = vmatpush1.bf16.msra.mxu0 %v4624_v15  ;;  %2634 = vmatpush1.bf16.msra.mxu1 %v4648_v49  ;;  %v4687_v15 = vld [vmem:[%s6277_s6 + $0x210] ss:$8 sps:$4 sm:$0xff]  }
 0x234   : > { %2073 = vmatprep.subr.bf16.mxu0 %v4629_v17  ;;  %2635 = vmatprep.subr.bf16.mxu1 %v4653_v50  ;;  %v4692_v17 = vld [vmem:[%s6277_s6 + $0x224] ss:$8 sps:$4 sm:$0xff]  }
 0x237   : > { %2074 = vmatpush1.bf16.msra.mxu0 %v4627_v19  ;;  %2636 = vmatpush1.bf16.msra.mxu1 %v4651_v51  ;;  %v4695_v19 = vld [vmem:[%s6277_s6 + $0x234] ss:$8 sps:$4 sm:$0xff]  }
 0x238   : > { %2075 = vmatprep.subr.bf16.mxu0 %v5682_v18  ;;  %2637 = vmatprep.subr.bf16.mxu1 %v4656_v30  ;;  %v4693_v18 = vld [vmem:[%s6277_s6 + $0x230] ss:$8 sps:$4 sm:$0xff]  }
 0x23b   : > { %2076 = vmatpush1.bf16.msra.mxu0 %v5687_v20  ;;  %2638 = vmatpush1.bf16.msra.mxu1 %v4654_v52  ;;  %v4698_v20 = vld [vmem:[%s6277_s6 + $0x244] ss:$8 sps:$4 sm:$0xff]  }
 0x23c   : > { %2077 = vmatprep.subr.bf16.mxu0 %v5693_v21  ;;  %2639 = vmatprep.subr.bf16.mxu1 %v4659_v53  ;;  %v4696_v21 = vld [vmem:[%s6277_s6 + $0x240] ss:$8 sps:$4 sm:$0xff]  }
 0x23f   : > { %2078 = vmatpush1.bf16.msra.mxu0 %v5699_v22  ;;  %2640 = vmatpush1.bf16.msra.mxu1 %v4657_v55  ;;  %v4701_v22 = vld [vmem:[%s6277_s6 + $0x254] ss:$8 sps:$4 sm:$0xff]  }
 0x240   : > { %2209 = vmatprep.subr.bf16.mxu0 %v5705_v23  ;;  %2668 = vmatprep.subr.bf16.mxu1 %v4662_v57  ;;  %v4699_v23 = vld [vmem:[%s6277_s6 + $0x250] ss:$8 sps:$4 sm:$0xff]  }
 0x242   : > { %2096 = vmatmul.mubr.bf16.vlgmr.msra.gmra.mrb[8].mxu0 %v5638_v4  ;;  %2658 = vmatmul.mubr.bf16.vlgmr.msra.gmra.mrb[12].mxu1 %v5773_v60  ;;  %v4716_v4 = vld [vmem:[%s6279_s8 + $0x14] ss:$8 sps:$4 sm:$0xff]  }
 0x243   : > { %2210 = vmatpush1.bf16.msra.mxu0 %v4636_v40  ;;  %2669 = vmatpush1.bf16.msra.mxu1 %v4660_v59  ;;  %v4725_v40 = vld [vmem:[%s6279_s8 + $0xa4] ss:$8 sps:$4 sm:$0xff]  }
 0x244   : > { %2211 = vmatprep.subr.bf16.mxu0 %v4641_v42  ;;  %2670 = vmatprep.subr.bf16.mxu1 %v4665_v61  ;;  %v4723_v42 = vld [vmem:[%s6279_s8 + $0xa0] ss:$8 sps:$4 sm:$0xff]  }
 0x245   : > { %2241 = vmatprep.mubr.bf16.mxu0 %v6318_v0  ;;  %2700 = vmatprep.mubr.bf16.mxu1 %v6318_v0 }
 0x247   : > { %2212 = vmatpush1.bf16.msra.mxu0 %v4639_v43  ;;  %2671 = vmatpush1.bf16.msra.mxu1 %v4663_v62  ;;  %v4728_v43 = vld [vmem:[%s6279_s8 + $0x34] ss:$8 sps:$4 sm:$0xff]  }
 0x248   : > { %2213 = vmatprep.subr.bf16.mxu0 %v4644_v44  ;;  %2672 = vmatprep.subr.bf16.mxu1 %v4668_v63  ;;  %v4731_v44 = vld [vmem:[%s6279_s8 + $0xb4] ss:$8 sps:$4 sm:$0xff]  }
 0x24b   : > { %2214 = vmatpush1.bf16.msra.mxu0 %v4642_v45  ;;  %2673 = vmatpush1.bf16.msra.mxu1 %v4666_v27  ;;  %v4726_v45 = vld [vmem:[%s6279_s8 + $0x30] ss:$8 sps:$4 sm:$0xff]  }
 0x24c   : > { %2215 = vmatprep.subr.bf16.mxu0 %v4647_v46  ;;  %2674 = vmatprep.subr.bf16.mxu1 %v4671_v1  ;;  %v4729_v46 = vld [vmem:[%s6279_s8 + $0xb0] ss:$8 sps:$4 sm:$0xff]  }
 0x24f   : > { %2216 = vmatpush1.bf16.msra.mxu0 %v4645_v47  ;;  %2675 = vmatpush1.bf16.msra.mxu1 %v4669_v2  ;;  %v4734_v47 = vld [vmem:[%s6279_s8 + $0x44] ss:$8 sps:$4 sm:$0xff]  }
 0x250   : > { %2217 = vmatprep.subr.bf16.mxu0 %v4650_v48  ;;  %2676 = vmatprep.subr.bf16.mxu1 %v4674_v3  ;;  %v4737_v48 = vld [vmem:[%s6279_s8 + $0xc4] ss:$8 sps:$4 sm:$0xff]  }
 0x253   : > { %2218 = vmatpush1.bf16.msra.mxu0 %v4648_v49  ;;  %2677 = vmatpush1.bf16.msra.mxu1 %v4672_v6  ;;  %v4732_v49 = vld [vmem:[%s6279_s8 + $0x40] ss:$8 sps:$4 sm:$0xff]  }
 0x254   : > { %2219 = vmatprep.subr.bf16.mxu0 %v4653_v50  ;;  %2678 = vmatprep.subr.bf16.mxu1 %v4677_v8  ;;  %v4735_v50 = vld [vmem:[%s6279_s8 + $0xc0] ss:$8 sps:$4 sm:$0xff]  }
 0x257   : > { %2220 = vmatpush1.bf16.msra.mxu0 %v4651_v51  ;;  %2679 = vmatpush1.bf16.msra.mxu1 %v4675_v10  ;;  %v4740_v51 = vld [vmem:[%s6279_s8 + $0x54] ss:$8 sps:$4 sm:$0xff]  }
 0x258   : > { %2221 = vmatprep.subr.bf16.mxu0 %v4656_v30  ;;  %2680 = vmatprep.subr.bf16.mxu1 %v4680_v12  ;;  %v4738_v30 = vld [vmem:[%s6279_s8 + $0x50] ss:$8 sps:$4 sm:$0xff]  }
 0x25b   : > { %2222 = vmatpush1.bf16.msra.mxu0 %v4654_v52  ;;  %2681 = vmatpush1.bf16.msra.mxu1 %v4678_v16  ;;  %v4743_v52 = vld [vmem:[%s6279_s8 + $0xd4] ss:$8 sps:$4 sm:$0xff]  }
 0x25c   : > { %2223 = vmatprep.subr.bf16.mxu0 %v4659_v53  ;;  %2682 = vmatprep.subr.bf16.mxu1 %v4683_v26  ;;  %v4741_v53 = vld [vmem:[%s6279_s8 + $0xd0] ss:$8 sps:$4 sm:$0xff]  }
 0x25f   : > { %2224 = vmatpush1.bf16.msra.mxu0 %v4657_v55  ;;  %2683 = vmatpush1.bf16.msra.mxu1 %v4681_v5  ;;  %v4744_v55 = vld [vmem:[%s6279_s8 + $0x60] ss:$8 sps:$4 sm:$0xff]  }
 0x260   : > { %2357 = vmatprep.subr.bf16.mxu0 %v4662_v57  ;;  %2714 = vmatprep.subr.bf16.mxu1 %v4686_v7  ;;  %v4747_v57 = vld [vmem:[%s6279_s8 + $0xe0] ss:$8 sps:$4 sm:$0xff]  }
 0x262   : > { %2242 = vmatmul.mubr.bf16.vlgmr.msra.gmra.mrb[8].mxu0 %v5645_v14  ;;  %2701 = vmatmul.mubr.bf16.vlgmr.msra.gmra.mrb[12].mxu1 %v2418_v11  ;;  %v4690_v14 = vld [vmem:[%s6277_s6 + $0x220] ss:$8 sps:$4 sm:$0xff]  }
 0x263   : > { %2358 = vmatpush1.bf16.msra.mxu0 %v4660_v59  ;;  %2715 = vmatpush1.bf16.msra.mxu1 %v4684_v9  ;;  %v4750_v59 = vld [vmem:[%s6279_s8 + $0x70] ss:$8 sps:$4 sm:$0xff]  }
 0x264   : > { %2359 = vmatprep.subr.bf16.mxu0 %v4665_v61  ;;  %2716 = vmatprep.subr.bf16.mxu1 %v4689_v13  ;;  %v4753_v61 = vld [vmem:[%s6279_s8 + $0xf0] ss:$8 sps:$4 sm:$0xff]  }
 0x265   : > { %2389 = vmatprep.mubr.bf16.mxu0 %v6318_v0  ;;  %2746 = vmatprep.mubr.bf16.mxu1 %v6318_v0 }
 0x267   : > { %2360 = vmatpush1.bf16.msra.mxu0 %v4663_v62  ;;  %2717 = vmatpush1.bf16.msra.mxu1 %v4687_v15  ;;  %v4758_v62 = vld [vmem:[%s6279_s8 + $0x184] ss:$8 sps:$4 sm:$0xff]  }
 0x268   : > { %2361 = vmatprep.subr.bf16.mxu0 %v4668_v63  ;;  %2718 = vmatprep.subr.bf16.mxu1 %v4692_v17  ;;  %v4761_v63 = vld [vmem:[%s6279_s8 + $0x104] ss:$8 sps:$4 sm:$0xff]  }
 0x26b   : > { %2362 = vmatpush1.bf16.msra.mxu0 %v4666_v27  ;;  %2719 = vmatpush1.bf16.msra.mxu1 %v4690_v14 }
 0x26c   : > { %2363 = vmatprep.subr.bf16.mxu0 %v4671_v1  ;;  %2720 = vmatprep.subr.bf16.mxu1 %v4695_v19 }
 0x26f   : > { %2364 = vmatpush1.bf16.msra.mxu0 %v4669_v2  ;;  %2721 = vmatpush1.bf16.msra.mxu1 %v4693_v18 }
 0x270   : > { %2365 = vmatprep.subr.bf16.mxu0 %v4674_v3  ;;  %2722 = vmatprep.subr.bf16.mxu1 %v4698_v20 }
 0x273   : > { %2366 = vmatpush1.bf16.msra.mxu0 %v4672_v6  ;;  %2723 = vmatpush1.bf16.msra.mxu1 %v4696_v21 }
 0x274   : > { %2367 = vmatprep.subr.bf16.mxu0 %v4677_v8  ;;  %2724 = vmatprep.subr.bf16.mxu1 %v4701_v22 }
 0x277   : > { %2368 = vmatpush1.bf16.msra.mxu0 %v4675_v10  ;;  %2725 = vmatpush1.bf16.msra.mxu1 %v4699_v23 }
 0x278   : > { %2369 = vmatprep.subr.bf16.mxu0 %v4680_v12  ;;  %2726 = vmatprep.subr.bf16.mxu1 %v4704_v24 }
 0x27b   : > { %2370 = vmatpush1.bf16.msra.mxu0 %v4678_v16  ;;  %2727 = vmatpush1.bf16.msra.mxu1 %v4702_v25 }
 0x27c   : > { %2371 = vmatprep.subr.bf16.mxu0 %v4683_v26  ;;  %2728 = vmatprep.subr.bf16.mxu1 %v4707_v28  ;;  %v4122_v26 = vld [vmem:[%s6278_s7] ss:$0 sm:$0xff] }
 0x27f   : > { %2372 = vmatpush1.bf16.msra.mxu0 %v4681_v5  ;;  %2729 = vmatpush1.bf16.msra.mxu1 %v4705_v29 }
 0x280   : > { %2500 = vmatprep.subr.bf16.mxu0 %v4686_v7  ;;  %3007 = vmatprep.subr.bf16.mxu1 %v4710_v33  ;;  %v4777_v33 = vld [vmem:[%s6279_s8 + $0x130] ss:$8 sps:$4 sm:$0xff]  }
 0x282   : > { %2390 = vmatmul.mubr.bf16.vlgmr.msra.gmra.mrb[8].mxu0 %v5773_v60  ;;  %2747 = vmatmul.mubr.bf16.vlgmr.msra.gmra.mrb[12].mxu1 %v2712_v31  ;;  %v4755_v60 = vld [vmem:[%s6279_s8 + $0xf4] ss:$8 sps:$4 sm:$0xff]   ;;  %v4774_v31 = vld [vmem:[%s6279_s8 + $0x1b0] ss:$8 sps:$4 sm:$0xff]  }
 0x283   : > { %2501 = vmatpush1.bf16.msra.mxu0 %v4684_v9  ;;  %2532 = vmatprep.mubr.bf16.mxu0 %v6318_v0 }
 0x284   : > { %2502 = vmatprep.subr.bf16.mxu0 %v4689_v13  ;;  %3039 = vmatprep.mubr.bf16.mxu1 %v6318_v0  ;;  %v4756_v13 = vld [vmem:[%s6279_s8 + $0x180] ss:$8 sps:$4 sm:$0xff]  }
 0x285   : > { %3008 = vmatpush1.bf16.msra.mxu1 %v4708_v32  ;;  %v4782_v32 = vld [vmem:[%s6279_s8 + $0x1c4] ss:$8 sps:$4 sm:$0xff]  }
 0x286   : > { %3009 = vmatprep.subr.bf16.mxu1 %v4716_v4  ;;  %v4788_v4 = vld [vmem:[%s6279_s8 + $0x1d4] ss:$8 sps:$4 sm:$0xff]  }
 0x287   : > { %2503 = vmatpush1.bf16.msra.mxu0 %v4687_v15 }
 0x288   : > { %2504 = vmatprep.subr.bf16.mxu0 %v4692_v17  ;;  %v4764_v17 = vld [vmem:[%s6279_s8 + $0x194] ss:$8 sps:$4 sm:$0xff]  }
 0x289   : > { %3010 = vmatpush1.bf16.msra.mxu1 %v4714_v37  ;;  %v4791_v37 = vld [vmem:[%s6279_s8 + $0x154] ss:$8 sps:$4 sm:$0xff]  }
 0x28a   : > { %3011 = vmatprep.subr.bf16.mxu1 %v4722_v39  ;;  %v4794_v39 = vld [vmem:[%s6279_s8 + $0x1e4] ss:$8 sps:$4 sm:$0xff]  }
 0x28b   : > { %2505 = vmatpush1.bf16.msra.mxu0 %v4690_v14  ;;  %v4759_v14 = vld [vmem:[%s6279_s8 + $0x100] ss:$8 sps:$4 sm:$0xff]  }
 0x28c   : > { %2506 = vmatprep.subr.bf16.mxu0 %v4695_v19 }
 0x28d   : > { %3012 = vmatpush1.bf16.msra.mxu1 %v4720_v41  ;;  %v4797_v41 = vld [vmem:[%s6279_s8 + $0x164] ss:$8 sps:$4 sm:$0xff]  }
 0x28e   : > { %3013 = vmatprep.subr.bf16.mxu1 %v4728_v43  ;;  %v4800_v43 = vld [vmem:[%s6279_s8 + $0x1f4] ss:$8 sps:$4 sm:$0xff]  }
 0x28f   : > { %2507 = vmatpush1.bf16.msra.mxu0 %v4693_v18  ;;  %v4767_v18 = vld [vmem:[%s6279_s8 + $0x114] ss:$8 sps:$4 sm:$0xff]  }
 0x290   : > { %2508 = vmatprep.subr.bf16.mxu0 %v4698_v20  ;;  %v4762_v20 = vld [vmem:[%s6279_s8 + $0x190] ss:$8 sps:$4 sm:$0xff]  }
 0x291   : > { %3014 = vmatpush1.bf16.msra.mxu1 %v4726_v45  ;;  %v4803_v45 = vld [vmem:[%s6279_s8 + $0x174] ss:$8 sps:$4 sm:$0xff]  }
 0x292   : > { %3015 = vmatprep.subr.bf16.mxu1 %v4734_v47  ;;  %v4801_v47 = vld [vmem:[%s6279_s8 + $0x170] ss:$8 sps:$4 sm:$0xff]  }
 0x293   : > { %2509 = vmatpush1.bf16.msra.mxu0 %v4696_v21  ;;  %v4770_v21 = vld [vmem:[%s6279_s8 + $0x1a4] ss:$8 sps:$4 sm:$0xff]  }
 0x294   : > { %2510 = vmatprep.subr.bf16.mxu0 %v4701_v22  ;;  %v4765_v22 = vld [vmem:[%s6279_s8 + $0x110] ss:$8 sps:$4 sm:$0xff]  }
 0x295   : > { %3016 = vmatpush1.bf16.msra.mxu1 %v4732_v49 }
 0x296   : > { %3017 = vmatprep.subr.bf16.mxu1 %v4740_v51 }
 0x297   : > { %2511 = vmatpush1.bf16.msra.mxu0 %v4699_v23  ;;  %v4773_v23 = vld [vmem:[%s6279_s8 + $0x124] ss:$8 sps:$4 sm:$0xff]  }
 0x298   : > { %2512 = vmatprep.subr.bf16.mxu0 %v4704_v24  ;;  %v4768_v24 = vld [vmem:[%s6279_s8 + $0x1a0] ss:$8 sps:$4 sm:$0xff]  }
 0x299   : > { %3018 = vmatpush1.bf16.msra.mxu1 %v4738_v30  ;;  %v4809_v30 = vld [vmem:[%s6279_s8 + $0x214] ss:$8 sps:$4 sm:$0xff]  }
 0x29a   : > { %3019 = vmatprep.subr.bf16.mxu1 %v4746_v54  ;;  %v4810_v54 = vld [vmem:[%s6279_s8 + $0x220] ss:$8 sps:$4 sm:$0xff]  }
 0x29b   : > { %2513 = vmatpush1.bf16.msra.mxu0 %v4702_v25  ;;  %v4776_v25 = vld [vmem:[%s6279_s8 + $0x1b4] ss:$8 sps:$4 sm:$0xff]  }
 0x29c   : > { %2514 = vmatprep.subr.bf16.mxu0 %v4707_v28  ;;  %v4771_v28 = vld [vmem:[%s6279_s8 + $0x120] ss:$8 sps:$4 sm:$0xff]  }
 0x29d   : > { %3020 = vmatpush1.bf16.msra.mxu1 %v4744_v55  ;;  %v4815_v55 = vld [vmem:[%s6279_s8 + $0x234] ss:$8 sps:$4 sm:$0xff]  }
 0x29e   : > { %3021 = vmatprep.subr.bf16.mxu1 %v4752_v58  ;;  %v4821_v58 = vld [vmem:[%s6279_s8 + $0x254] ss:$8 sps:$4 sm:$0xff]  }
 0x29f   : > { %2515 = vmatpush1.bf16.msra.mxu0 %v4705_v29  ;;  %v4779_v29 = vld [vmem:[%s6279_s8 + $0x134] ss:$8 sps:$4 sm:$0xff]  }
 0x2a0   : > { %2886 = vmatprep.subr.bf16.mxu0 %v4713_v35  ;;  %v4780_v35 = vld [vmem:[%s6279_s8 + $0x1c0] ss:$8 sps:$4 sm:$0xff]  }
 0x2a1   : > { %3022 = vmatpush1.bf16.msra.mxu1 %v4750_v59  ;;  %v4819_v59 = vld [vmem:[%s6279_s8 + $0x250] ss:$8 sps:$4 sm:$0xff]  }
 0x2a2   : > { %2533 = vmatmul.mubr.bf16.vlgmr.msra.gmra.mrb[8].mxu0 %v2418_v11  ;;  %3290 = vmatprep.subr.bf16.mxu1 %v4758_v62  ;;  %v4827_v62 = vld [vmem:[%s6279_s8 + $0x274] ss:$8 sps:$4 sm:$0xff]  }
 0x2a3   : > { %2918 = vmatprep.mubr.bf16.mxu0 %v6318_v0  ;;  %2887 = vmatpush1.bf16.msra.mxu0 %v4711_v34  ;;  %v4785_v34 = vld [vmem:[%s6279_s8 + $0x144] ss:$8 sps:$4 sm:$0xff]  }
 0x2a4   : > { %2888 = vmatprep.subr.bf16.mxu0 %v4719_v36  ;;  %v4783_v36 = vld [vmem:[%s6279_s8 + $0x140] ss:$8 sps:$4 sm:$0xff]  }
 0x2a7   : > { %2889 = vmatpush1.bf16.msra.mxu0 %v4717_v38  ;;  %v4786_v38 = vld [vmem:[%s6279_s8 + $0x1d0] ss:$8 sps:$4 sm:$0xff]  }
 0x2a8   : > { %2890 = vmatprep.subr.bf16.mxu0 %v4725_v40  ;;  %v4789_v40 = vld [vmem:[%s6279_s8 + $0x150] ss:$8 sps:$4 sm:$0xff]  }
 0x2ab   : > { %2891 = vmatpush1.bf16.msra.mxu0 %v4723_v42  ;;  %v4792_v42 = vld [vmem:[%s6279_s8 + $0x1e0] ss:$8 sps:$4 sm:$0xff]  }
 0x2ac   : > { %2892 = vmatprep.subr.bf16.mxu0 %v4731_v44  ;;  %v4795_v44 = vld [vmem:[%s6279_s8 + $0x160] ss:$8 sps:$4 sm:$0xff]  }
 0x2af   : > { %2893 = vmatpush1.bf16.msra.mxu0 %v4729_v46  ;;  %v4798_v46 = vld [vmem:[%s6279_s8 + $0x1f0] ss:$8 sps:$4 sm:$0xff]  }
 0x2b0   : > { %2894 = vmatprep.subr.bf16.mxu0 %v4737_v48  ;;  %v4806_v48 = vld [vmem:[%s6279_s8 + $0x204] ss:$8 sps:$4 sm:$0xff]  }
 0x2b3   : > { %2895 = vmatpush1.bf16.msra.mxu0 %v4735_v50  ;;  %v4804_v50 = vld [vmem:[%s6279_s8 + $0x200] ss:$8 sps:$4 sm:$0xff]  }
 0x2b4   : > { %2896 = vmatprep.subr.bf16.mxu0 %v4743_v52  ;;  %v4807_v52 = vld [vmem:[%s6279_s8 + $0x210] ss:$8 sps:$4 sm:$0xff]  }
 0x2b7   : > { %2897 = vmatpush1.bf16.msra.mxu0 %v4741_v53  ;;  %v4812_v53 = vld [vmem:[%s6279_s8 + $0x224] ss:$8 sps:$4 sm:$0xff]  }
 0x2b8   : > { %2898 = vmatprep.subr.bf16.mxu0 %v4749_v56  ;;  %v4818_v56 = vld [vmem:[%s6279_s8 + $0x244] ss:$8 sps:$4 sm:$0xff]  }
 0x2bb   : > { %2899 = vmatpush1.bf16.msra.mxu0 %v4747_v57  ;;  %v4816_v57 = vld [vmem:[%s6279_s8 + $0x240] ss:$8 sps:$4 sm:$0xff]  }
 0x2bc   : > { %2900 = vmatprep.subr.bf16.mxu0 %v4755_v60  ;;  %v4824_v60 = vld [vmem:[%s6279_s8 + $0x264] ss:$8 sps:$4 sm:$0xff]  }
 0x2bf   : > { %2901 = vmatpush1.bf16.msra.mxu0 %v4753_v61  ;;  %v4822_v61 = vld [vmem:[%s6279_s8 + $0x260] ss:$8 sps:$4 sm:$0xff]  }
 0x2c0   : > { %3148 = vmatprep.subr.bf16.mxu0 %v4761_v63  ;;  %v4825_v63 = vld [vmem:[%s6279_s8 + $0x270] ss:$8 sps:$4 sm:$0xff]  }
 0x355   : > { %v2748_v27 = vpop.f32.mrb[12].mxu1 }
 0x356   : > { %v2750_v1 = vpop.f32.mrb[13].mxu1 }
 0x357   : > { %v2758_v2 = vmax.f32 %v2748_v27, %v2750_v1  ;;  %v2752_v3 = vpop.f32.mrb[14].mxu1  ;;  %v4828_v1 = vld [vmem:[%s6281_s10 + $0x40] sm:$0xff]  }
 0x358   : > { %v2753_v6 = vpop.f32.mrb[15].mxu1  ;;  %v4830_v3 = vld [vmem:[%s6281_s10 + $0x48] sm:$0xff]  }
 0x359   : > { %v4831_v6 = vld [vmem:[%s6281_s10 + $0x8] sm:$0xff]  }
 0x375   : > { %v2534_v8 = vpop.f32.mrb[8].mxu0 }
 0x376   : > { %v2536_v10 = vpop.f32.mrb[9].mxu0 }
 0x377   : > { %v2757_v12 = vmax.f32 %v2534_v8, %v2536_v10  ;;  %v2538_v16 = vpop.f32.mrb[10].mxu0  ;;  %v4832_v8 = vld [vmem:[%s6281_s10 + $0x50] sm:$0xff]  }
 0x378   : > { %v2539_v5 = vpop.f32.mrb[11].mxu0  ;;  %v4833_v10 = vld [vmem:[%s6281_s10 + $0x10] sm:$0xff]   ;;  %v4835_v16 = vld [vmem:[%s6281_s10 + $0x18] sm:$0xff]  }
 0x379   : > { %v2759_v7 = vmax.f32 %v2757_v12, %v2758_v2  ;;  %v4829_v2 = vld [vmem:[%s6281_s10] sm:$0xff]   ;;  %v4834_v12 = vld [vmem:[%s6281_s10 + $0x58] sm:$0xff]  }
 0x37a   : > { %v4837_v5 = vld [vmem:[%s6281_s10 + $0x20] sm:$0xff]  }
 0x37b   : > { %v2766_v9 = vadd.f32 %v4122_v26, %v2759_v7  ;;  %v4836_v26 = vld [vmem:[%s6281_s10 + $0x60] sm:$0xff]   ;;  %v4838_v7 = vld [vmem:[%s6281_s10 + $0x68] sm:$0xff]  }
 0x37d   : > { %v2767_v11 = vmax.f32 %v2766_v9, 0.0  ;;  %v4839_v9 = vld [vmem:[%s6281_s10 + $0x28] sm:$0xff]  }
 0x37f   : > { %v5990_v15 = vpack.c.bf16 %v2767_v11, %v2767_v11  ;;  %v4840_v11 = vld [vmem:[%s6281_s10 + $0x70] sm:$0xff]  }
 0x381   : > { %3040 = vmatmul.mubr.bf16.vlgmr.msra.gmra.mrb[16].mxu1 %v5990_v15  ;;  %v2803_v19 = vshrl.u32 %v5990_v15, 16  ;;  %v3066_v51 = vrot.slane %v5990_v15, 1  ;;  %v3350_v27 = vrot.slane %v5990_v15, 2  ;;  %v4842_v15 = vld [vmem:[%s6281_s10 + $0x78] sm:$0xff]  }
 0x382   : > { %3291 = vmatpush1.bf16.msra.mxu1 %v4756_v13  ;;  %3322 = vmatprep.mubr.bf16.mxu1 %v6318_v0  ;;  %v4841_v13 = vld [vmem:[%s6281_s10 + $0x30] sm:$0xff]  }
 0x383   : > { %2919 = vmatmul.mubr.bf16.vlgmr.msra.gmra.mrb[12].mxu0 %v2803_v19  ;;  %3292 = vmatprep.subr.bf16.mxu1 %v4764_v17  ;;  %v3208_v49 = vrot.slane %v2803_v19, 1  ;;  %v4843_v17 = vld [vmem:[%s6281_s10 + $0x38] sm:$0xff]   ;;  %v4962_v19 = vmov 0.0  }
 0x384   : > { %3149 = vmatpush1.bf16.msra.mxu0 %v4759_v14  ;;  %3180 = vmatprep.mubr.bf16.mxu0 %v6318_v0  ;;  %v4844_v14 = vld [vmem:[%s6283_s12] sm:$0xff]  }
 0x385   : > { %3150 = vmatprep.subr.bf16.mxu0 %v4767_v18  ;;  %v4845_v18 = vld [vmem:[%s6283_s12 + $0x8] sm:$0xff]  }
 0x386   : > { %3293 = vmatpush1.bf16.msra.mxu1 %v4762_v20  ;;  %v4846_v20 = vld [vmem:[%s6283_s12 + $0x10] sm:$0xff]  }
 0x387   : > { %3294 = vmatprep.subr.bf16.mxu1 %v4770_v21  ;;  %v4847_v21 = vld [vmem:[%s6283_s12 + $0x18] sm:$0xff]  }
 0x388   : > { %3151 = vmatpush1.bf16.msra.mxu0 %v4765_v22  ;;  %v4848_v22 = vld [vmem:[%s6283_s12 + $0x20] sm:$0xff]  }
 0x389   : > { %3152 = vmatprep.subr.bf16.mxu0 %v4773_v23  ;;  %v4849_v23 = vld [vmem:[%s6283_s12 + $0x28] sm:$0xff]  }
 0x38a   : > { %3295 = vmatpush1.bf16.msra.mxu1 %v4768_v24 }
 0x38b   : > { %3296 = vmatprep.subr.bf16.mxu1 %v4776_v25 }
 0x38c   : > { %3153 = vmatpush1.bf16.msra.mxu0 %v4771_v28 }
 0x38d   : > { %3154 = vmatprep.subr.bf16.mxu0 %v4779_v29 }
 0x38e   : > { %3297 = vmatpush1.bf16.msra.mxu1 %v4774_v31 }
 0x38f   : > { %3298 = vmatprep.subr.bf16.mxu1 %v4782_v32 }
 0x390   : > { %3155 = vmatpush1.bf16.msra.mxu0 %v4777_v33 }
 0x391   : > { %3156 = vmatprep.subr.bf16.mxu0 %v4785_v34 }
 0x392   : > { %3299 = vmatpush1.bf16.msra.mxu1 %v4780_v35 }
 0x393   : > { %3300 = vmatprep.subr.bf16.mxu1 %v4788_v4 }
 0x394   : > { %3157 = vmatpush1.bf16.msra.mxu0 %v4783_v36 }
 0x395   : > { %3158 = vmatprep.subr.bf16.mxu0 %v4791_v37 }
 0x396   : > { %3301 = vmatpush1.bf16.msra.mxu1 %v4786_v38 }
 0x397   : > { %3302 = vmatprep.subr.bf16.mxu1 %v4794_v39 }
 0x398   : > { %3159 = vmatpush1.bf16.msra.mxu0 %v4789_v40 }
 0x399   : > { %3160 = vmatprep.subr.bf16.mxu0 %v4797_v41 }
 0x39a   : > { %3303 = vmatpush1.bf16.msra.mxu1 %v4792_v42 }
 0x39b   : > { %3304 = vmatprep.subr.bf16.mxu1 %v4800_v43 }
 0x39c   : > { %3161 = vmatpush1.bf16.msra.mxu0 %v4795_v44 }
 0x39d   : > { %3162 = vmatprep.subr.bf16.mxu0 %v4803_v45 }
 0x39e   : > { %3305 = vmatpush1.bf16.msra.mxu1 %v4798_v46 }
 0x39f   : > { %4294 = vmatprep.subr.bf16.mxu1 %v4828_v1  ;;  %v4850_v1 = vld [vmem:[%s6283_s12 + $0x30] sm:$0xff]  }
 0x3a0   : > { %3163 = vmatpush1.bf16.msra.mxu0 %v4801_v47 }
 0x3a1   : > { %3323 = vmatmul.mubr.bf16.vlgmr.msra.gmra.mrb[20].mxu1 %v3208_v49  ;;  %3432 = vmatprep.subr.bf16.mxu0 %v4806_v48  ;;  %v3476_v48 = vlaneseq }
 0x3a2   : > { %4295 = vmatpush3.bf16.msra.mxu1 %v4829_v2  ;;  %v4851_v2 = vld [vmem:[%s6283_s12 + $0x38] sm:$0xff]  }
 0x3a3   : > { %3181 = vmatmul.mubr.bf16.vlgmr.msra.gmra.mrb[16].mxu0 %v3066_v51  ;;  %4296 = vmatprep.subr.bf16.mxu1 %v4830_v3  ;;  %v3477_v49 = vshrl.u32 %v3476_v48, 7  ;;  %v531_v51 = vld [vmem:[%s6280_s9] sm:$0x3] }
 0x3a4   : > { %3433 = vmatpush1.bf16.msra.mxu0 %v4804_v50  ;;  %3464 = vmatprep.mubr.bf16.mxu0 %v6318_v0  ;;  %v4813_v0 = vld [vmem:[%s6279_s8 + $0x230] ss:$8 sps:$4 sm:$0xff]  }
 0x3a5   : > { %3434 = vmatprep.subr.bf16.mxu0 %v4809_v30  ;;  %v3478_v50 = vsub.s32 0, %v3477_v49  ;;  %v3482_v30 = vsub.s32 1, %v3477_v49 }
 0x3a6   : > { %4297 = vmatpush3.bf16.msra.mxu1 %v4831_v6  ;;  %v532_v6 = vld [vmem:[%s6282_s11] sm:$0x1] }
 0x3a7   : > { %4298 = vmatprep.subr.bf16.mxu1 %v4832_v8 }
 0x3a8   : > { %3435 = vmatpush1.bf16.msra.mxu0 %v4807_v52  ;;  %v3479_v52 = vrot.slane %v531_v51, %v3478_v50 }
 0x3a9   : > { %3436 = vmatprep.subr.bf16.mxu0 %v4812_v53 }
 0x3aa   : > { %4299 = vmatpush3.bf16.msra.mxu1 %v4833_v10 }
 0x3ab   : > { %4300 = vmatprep.subr.bf16.mxu1 %v4834_v12 }
 0x3ac   : > { %3437 = vmatpush1.bf16.msra.mxu0 %v4810_v54  ;;  %v3483_v54 = vrot.slane %v531_v51, %v3482_v30 }
 0x3ad   : > { %3438 = vmatprep.subr.bf16.mxu0 %v4815_v55 }
 0x3ae   : > { %4301 = vmatpush3.bf16.msra.mxu1 %v4835_v16 }
 0x3af   : > { %4302 = vmatprep.subr.bf16.mxu1 %v4836_v26 }
 0x3b0   : > { %3439 = vmatpush1.bf16.msra.mxu0 %v4813_v0 }
 0x3b1   : > { %3440 = vmatprep.subr.bf16.mxu0 %v4818_v56 }
 0x3b2   : > { %4303 = vmatpush3.bf16.msra.mxu1 %v4837_v5 }
 0x3b3   : > { %4304 = vmatprep.subr.bf16.mxu1 %v4838_v7 }
 0x3b4   : > { %3441 = vmatpush1.bf16.msra.mxu0 %v4816_v57 }
 0x3b5   : > { %3442 = vmatprep.subr.bf16.mxu0 %v4821_v58 }
 0x3b6   : > { %4305 = vmatpush3.bf16.msra.mxu1 %v4839_v9  ;;  %v533_v9 = vld [vmem:[%s6284_s13] sm:$0x1] }
 0x3b7   : > { %4306 = vmatprep.subr.bf16.mxu1 %v4840_v11 }
 0x3b8   : > { %3443 = vmatpush1.bf16.msra.mxu0 %v4819_v59 }
 0x3b9   : > { %3444 = vmatprep.subr.bf16.mxu0 %v4824_v60 }
 0x3ba   : > { %4307 = vmatpush3.bf16.msra.mxu1 %v4841_v13 }
 0x3bb   : > { %4308 = vmatprep.subr.bf16.mxu1 %v4842_v15 }
 0x3bc   : > { %3445 = vmatpush1.bf16.msra.mxu0 %v4822_v61 }
 0x3bd   : > { %3446 = vmatprep.subr.bf16.mxu0 %v4827_v62 }
 0x3be   : > { %4309 = vmatpush3.bf16.msra.mxu1 %v4843_v17 }
 0x3c0   : > { %3447 = vmatpush1.bf16.msra.mxu0 %v4825_v63 }
 0x3c1   : > { %4325 = vmatprep.subr.bf16.mxu0 %v4962_v19 }
 0x3c3   : > { %3465 = vmatmul.mubr.bf16.vlgmr.msra.gmra.mrb[20].mxu0 %v3350_v27 }
 0x3c4   : > { %4326 = vmatpush3.bf16.msra.mxu0 %v4844_v14  ;;  %4341 = vmatprep.mubr.msk.bf16.mxu0 %vm4963_vm1, %v4962_v19 }
 0x3c5   : > { %4327 = vmatprep.subr.bf16.mxu0 %v4962_v19 }
 0x3c8   : > { %4328 = vmatpush3.bf16.msra.mxu0 %v4845_v18 }
 0x3c9   : > { %4329 = vmatprep.subr.bf16.mxu0 %v4962_v19 }
 0x3cc   : > { %4330 = vmatpush3.bf16.msra.mxu0 %v4846_v20 }
 0x3cd   : > { %4331 = vmatprep.subr.bf16.mxu0 %v4962_v19 }
 0x3d0   : > { %4332 = vmatpush3.bf16.msra.mxu0 %v4847_v21 }
 0x3d1   : > { %4333 = vmatprep.subr.bf16.mxu0 %v4962_v19 }
 0x3d4   : > { %4334 = vmatpush3.bf16.msra.mxu0 %v4848_v22 }
 0x3d5   : > { %4335 = vmatprep.subr.bf16.mxu0 %v4962_v19 }
 0x3d8   : > { %4336 = vmatpush3.bf16.msra.mxu0 %v4849_v23 }
 0x3d9   : > { %4337 = vmatprep.subr.bf16.mxu0 %v4962_v19 }
 0x3dc   : > { %4338 = vmatpush3.bf16.msra.mxu0 %v4850_v1 }
 0x3dd   : > { %4339 = vmatprep.subr.bf16.mxu0 %v4962_v19 }
 0x3e0   : > { %4340 = vmatpush3.bf16.msra.mxu0 %v4851_v2 }
 0x454   : > { %v3041_v24 = vpop.f32.mrb[16].mxu1 }
 0x455   : > { %v3043_v25 = vpop.f32.mrb[17].mxu1 }
 0x456   : > { %v2920_v28 = vpop.f32.mrb[12].mxu0  ;;  %v3045_v29 = vpop.f32.mrb[18].mxu1 }
 0x457   : > { %v3042_v31 = vadd.f32 %v3041_v24, %v2920_v28  ;;  %v2922_v32 = vpop.f32.mrb[13].mxu0  ;;  %v3046_v33 = vpop.f32.mrb[19].mxu1 }
 0x458   : > { %v3044_v34 = vadd.f32 %v3043_v25, %v2922_v32  ;;  %v2924_v35 = vpop.f32.mrb[14].mxu0 }
 0x459   : > { %v2925_v4 = vpop.f32.mrb[15].mxu0 }
 0x474   : > { %v3324_v36 = vpop.f32.mrb[20].mxu1 }
 0x475   : > { %v3326_v37 = vpop.f32.mrb[21].mxu1 }
 0x476   : > { %v3182_v38 = vpop.f32.mrb[16].mxu0  ;;  %v3328_v39 = vpop.f32.mrb[22].mxu1 }
 0x477   : > { %v3189_v40 = vadd.f32 %v3182_v38, %v3042_v31  ;;  %v3184_v41 = vpop.f32.mrb[17].mxu0  ;;  %v3329_v42 = vpop.f32.mrb[23].mxu1 }
 0x478   : > { %v3190_v43 = vadd.f32 %v3184_v41, %v3044_v34  ;;  %v3186_v44 = vpop.f32.mrb[18].mxu0 }
 0x479   : > { %v3187_v45 = vpop.f32.mrb[19].mxu0  ;;  %v3331_v46 = vadd.f32 %v3324_v36, %v3189_v40 }
 0x47a   : > { %v3332_v47 = vadd.f32 %v3326_v37, %v3190_v43 }
 0x496   : > { %v3466_v53 = vpop.f32.mrb[20].mxu0 }
 0x497   : > { %v3473_v55 = vadd.f32 %v3466_v53, %v3331_v46  ;;  %v3468_v0 = vpop.f32.mrb[21].mxu0 }
 0x498   : > { %v3474_v56 = vadd.f32 %v3468_v0, %v3332_v47  ;;  %v3470_v57 = vpop.f32.mrb[22].mxu0 }
 0x499   : > { %v3486_v58 = vadd.f32 %v3479_v52, %v3473_v55  ;;  %v3471_v59 = vpop.f32.mrb[23].mxu0 }
 0x49a   : > { %v3487_v60 = vadd.f32 %v3483_v54, %v3474_v56 }
 0x49b   : > { %v3488_v61 = vmax.f32 %v3486_v58, 0.0 }
 0x49c   : > { %v3489_v62 = vmax.f32 %v3487_v60, 0.0 }
 0x49d   : > { %v3490_v27 = vpack.c.bf16 %v3488_v61, %v3488_v61 }
 0x49e   : > { %v3491_v63 = vpack.c.bf16 %v3489_v62, %v3489_v62 }
 0x4a0   : > { %3652 = vmatprep.mubr.bf16.mxu1 %v3491_v63 }
 0x4a1   : > { %3653 = vmatmul.mubr.bf16.vlgmr.msra.gmra.mrb[24].mxu1 %v3490_v27 }
 0x574   : > { %v4310_v3 = vpop.f32.mrb[24].mxu1 }
 0x575   : > { %v4311_v8 = vpop.f32.mrb[25].mxu1 }
 0x576   : > { %v4312_v10 = vadd.f32 %v4311_v8, %v4310_v3  ;;  %v4313_v12 = vpop.f32.mrb[26].mxu1 }
 0x577   : > { %v4314_v16 = vpop.f32.mrb[27].mxu1 }
 0x578   : > { %v3655_v26 = vadd.f32 %v4312_v10, %v532_v6 }
 0x57a   : > { %v3660_v5 = vmax.f32 %v3655_v26, 0.0 }
 0x57c   : > { %v3661_v7 = vpack.c.bf16 %v3660_v5, %v3660_v5 }
 0x57e   : > { %4342 = vmatmul.mubr.bf16.vlgmr.msra.gmra.mrb[24].mxu0 %v3661_v7 }
 0x651   : > { %v3760_v11 = vpop.f32.mrb[24].mxu0 }
 0x652   : > { %v3761_v13 = vadd.f32 %v3760_v11, %v533_v9  ;;  %v4343_v15 = vpop.f32.mrb[25].mxu0 }
 0x653   : > { %v3763_v17 = vpop.f32.mrb[26].mxu0 }
 0x654   : > { %3766 = vst [vmem:[%s511_s18] sm:$0x1] %v3761_v13  ;;  %v4344_v14 = vpop.f32.mrb[27].mxu0 }
 0x655   : > { %4903 = shalt.err (!%p4900_p7)
}
 0x656   : > { %s4904_s21 = scalar_lea.hbm %s6229_s27, 16  ;;  %s4908_s19 = scalar_lea.hbm %s6285_s14, 32 }
 0x657   : > { %p4905_p8 = scmp.ne.s32.totalorder %s6229_s27, %s4904_s21  ;;  %p4909_p1 = scmp.lt.u32.totalorder %s6229_s27, %s6285_s14 }
 0x658   : > { %p4910_p0 = scmp.lt.u32.totalorder %s4908_s19, %s4904_s21  ;;  %p4912_p6 = scmp.lt.u32.totalorder %s4904_s21, %s6229_s27 }
 0x659   : > { %p4906_p11 = pnand %p4905_p8, %p6323_p9 }
 0x65a   : > { %p4911_p5 = por %p4910_p0, %p4909_p1 }
 0x65b   : > { %p4907_p13 = pneg %p4906_p11 }
 0x65c   : > { %p4913_p10 = por %p4912_p6, %p4911_p5 }
 0x65e   : > { %p4914_p12 = pnand %p4913_p10, %p4907_p13 }
 0x660   : > { %4917 = shalt.err (!%p4914_p12)
}
 0x661   : > { %4443 = dma.vmem_to_hbm [thread:$0]  (%p6323_p9), %s6231_s20, 16, %s6229_s27, %s3768_s24  }
 0x662 PF: > { %s6324_s17 = sld [smem:[#allocation11_spill]]  ;;  %p4455_p2 = scmp.ge.s32.totalorder %s4956_s16, 2 }
 0x663   : > { %s3792_s26 = sand.u32 1, %s4944_s29  }
 0x664   : > { %s3793_s15 = scalar_lea.sflag [#allocation4], %s3792_s26 }
 0x668   : > { %p6325_p3 = scmp.ne.s32.totalorder %s6324_s17, 0 }
 0x66a   : > { %p4450_p4 = pnand %p4455_p2, %p6325_p3 }
 0x66c   : > { %4939 = dma.done.wait (!%p4450_p4), %s3793_s15, 16  }
 0x66d   : > { %4941 = vsyncadd (!%p4450_p4), %s3793_s15, 4294967280  ;;  %s6326_s16 = sld [smem:[#allocation9_spill]]  ;;  %s6327_s21 = sld [smem:[#allocation8_spill]] }
 0x66e   : > { %s6328_s15 = sld [smem:[#allocation10_spill]]  ;;  %s6329_s29 = smov %s4948_s30 }
 0x673   : > { %p25_p7 = scmp.ge.s32.totalorder %s6326_s16, 4   ;;  %s6330_s30 = smov %s6327_s21 }
 0x675   :  { %27 = sbr.rel (!%p25_p7) target bundleno = 4 (0x4), region = 137 }
 0x67c   :  { %3797 = vsyncpa [#allocation3], 1 }
 0x67d   :  { %3799 = vsyncpa [#allocation3 + $0x1], 1 }
 0x67e   :  { %3800 = vsyncpa [#allocation4], 1 }
 0x67f   :  { %3802 = vsyncpa [#allocation4 + $0x1], 1 }

</bundles_post_ra>
